<compile_context>
chip_gen: v7x
topology: tpu7x:2x2x1
jax: 0.10.0
libtpu: 0.0.40
codegen_flags: <defaults>
</compile_context>

<pallas_src>
import functools

import jax
import jax.numpy as jnp
from jax.experimental import pallas as pl
from jax.experimental.pallas import tpu as pltpu


def _round_up(x, m):
    return ((x + m - 1) // m) * m


# ---------------------------------------------------------------------------
# Pallas kernel: tiled GEMM, f32 accumulator, bias + LeakyReLU epilogue
# ---------------------------------------------------------------------------
def _gemm_bias_act_kernel(a_ref, w_ref, b_ref, o_ref, acc_ref, *, negative_slope):
    k = pl.program_id(2)

    @pl.when(k == 0)
    def _init():
        acc_ref[...] = jnp.zeros_like(acc_ref)

    acc_ref[...] += jnp.dot(a_ref[...], w_ref[...],
                            preferred_element_type=jnp.float32)

    @pl.when(k == pl.num_programs(2) - 1)
    def _finalize():
        out = acc_ref[...] + b_ref[...]           # bias applied once, in the epilogue
        if negative_slope is not None:
            out = jnp.where(out >= 0.0, out, out * negative_slope)
        o_ref[...] = out.astype(o_ref.dtype)


def gemm_bias_act(a, w, bias, negative_slope=None):
    """a: [M,K] bf16, w: [K,N] bf16, bias: [N] f32  ->  [M,N] f32."""
    M, K = a.shape
    Kw, N = w.shape
    assert K == Kw

    # MXU / lane-dense padding: K and N rounded to multiples of 128.
    K_pad = _round_up(K, 128)
    N_pad = _round_up(N, 128)

    # Tile sizes: tm multiple of 16 (bf16 sublane packing), tn/tk multiples of 128.
    tm = min(256, _round_up(M, 16))
    tn = 256 if (N_pad % 256 == 0) else 128
    if K_pad <= 512:
        tk = K_pad
    elif K_pad % 512 == 0:
        tk = 512
    elif K_pad % 256 == 0:
        tk = 256
    else:
        tk = 128
    M_pad = _round_up(M, tm)

    a_p = jnp.pad(a, ((0, M_pad - M), (0, K_pad - K)))
    w_p = jnp.pad(w, ((0, K_pad - K), (0, N_pad - N)))
    b_p = jnp.pad(bias.astype(jnp.float32).reshape(1, N), ((0, 0), (0, N_pad - N)))

    grid = (M_pad // tm, N_pad // tn, K_pad // tk)
    kernel = functools.partial(_gemm_bias_act_kernel, negative_slope=negative_slope)

    out = pl.pallas_call(
        kernel,
        out_shape=jax.ShapeDtypeStruct((M_pad, N_pad), jnp.float32),
        grid_spec=pltpu.PrefetchScalarGridSpec(
            num_scalar_prefetch=0,
            grid=grid,
            in_specs=[
                pl.BlockSpec((tm, tk), lambda i, j, k: (i, k)),
                pl.BlockSpec((tk, tn), lambda i, j, k: (k, j)),
                pl.BlockSpec((1, tn), lambda i, j, k: (0, j)),
            ],
            out_specs=pl.BlockSpec((tm, tn), lambda i, j, k: (i, j)),
            scratch_shapes=[pltpu.VMEM((tm, tn), jnp.float32)],
        ),
        compiler_params=pltpu.CompilerParams(
            dimension_semantics=("parallel", "parallel", "arbitrary"),
            vmem_limit_bytes=32 * 1024 * 1024,
        ),
    )(a_p, w_p, b_p)
    return out[:M, :N]


# ---------------------------------------------------------------------------
# Spectral normalization (one power iteration, torch spectral_norm forward)
# ---------------------------------------------------------------------------
def spectral_normalize(w, u, n_power_iterations=1, eps=1e-12):
    cout = w.shape[0]
    w_mat = w.reshape(cout, -1)
    v = None
    for _ in range(n_power_iterations):
        v = w_mat.T @ u
        v = v / jnp.maximum(jnp.linalg.norm(v), eps)   # F.normalize semantics
        u = w_mat @ v
        u = u / jnp.maximum(jnp.linalg.norm(u), eps)
    sigma = u @ (w_mat @ v)
    return w / sigma


# ---------------------------------------------------------------------------
# One spectral conv layer: space-to-depth + 2x2 im2col (glue) + tiled Pallas GEMM
# ---------------------------------------------------------------------------
def spectral_conv(x_nhwc, w, b, u, negative_slope=None):
    # x_nhwc: [N, H, W, Cin], w: [Cout, Cin, 4, 4] (PyTorch layout), stride=2, pad=1.
    w_sn = spectral_normalize(w, u)
    N, H, W, Cin = x_nhwc.shape
    Cout, _, KH, KW = w.shape
    stride, pad = 2, 1
    Ho = (H + 2 * pad - KH) // stride + 1
    Wo = (W + 2 * pad - KW) // stride + 1

    Hp, Wp = H + 2 * pad, W + 2 * pad
    Hp2, Wp2 = Hp + (Hp % 2), Wp + (Wp % 2)    # even dims for space-to-depth; extra rows unread
    xp = jnp.pad(x_nhwc, ((0, 0), (pad, pad + Hp2 - Hp), (pad, pad + Wp2 - Wp), (0, 0)))
    xp = xp.astype(jnp.bfloat16)               # bf16 MXU path; halves patch HBM traffic

    # space-to-depth(2): the 4x4/stride-2 conv becomes a 2x2/stride-1 conv,
    # so im2col only duplicates data 4x instead of 16x.
    Hs, Ws = Hp2 // 2, Wp2 // 2
    y = xp.reshape(N, Hs, 2, Ws, 2, Cin).transpose(0, 1, 3, 2, 4, 5)
    y = y.reshape(N, Hs, Ws, 4 * Cin)          # last dim ordered (dy, dx, cin)

    cols = [y[:, bh:bh + Ho, bw:bw + Wo, :] for bh in (0, 1) for bw in (0, 1)]
    patches = jnp.stack(cols, axis=3).reshape(N * Ho * Wo, 16 * Cin)  # (bh,bw,dy,dx,cin)

    # Weight flattened in the matching (bh, bw, dy, dx, cin) -> cout order.
    w_t = jnp.transpose(w_sn, (2, 3, 1, 0))            # [kh, kw, cin, cout]
    w_t = w_t.reshape(2, 2, 2, 2, Cin, Cout)           # [bh, dy, bw, dx, cin, cout]
    w_mat = jnp.transpose(w_t, (0, 2, 1, 3, 4, 5)).reshape(16 * Cin, Cout)
    w_mat = w_mat.astype(jnp.bfloat16)

    out = gemm_bias_act(patches, w_mat, b, negative_slope=negative_slope)
    return out.reshape(N, Ho, Wo, Cout)


# ---------------------------------------------------------------------------
# Full discriminator forward
# ---------------------------------------------------------------------------
def spectral_discriminator(x_nchw, params):
    x = jnp.transpose(x_nchw, (0, 2, 3, 1))            # NCHW -> NHWC
    n_layers = len(params)
    for i, (w, b, u) in enumerate(params):
        slope = 0.2 if i < n_layers - 1 else None      # LeakyReLU after conv1..conv4 only
        x = spectral_conv(x, w, b, u, negative_slope=slope)
    return jnp.transpose(x, (0, 3, 1, 2))              # NHWC -> NCHW
    # NOTE: self.up_sample / self.sigmoid are defined in __init__ but unused in forward().


def init_params(key, num_classes, ndf):
    layer_chans = [
        (num_classes, ndf),
        (ndf, ndf * 2),
        (ndf * 2, ndf * 4),
        (ndf * 4, ndf * 8),
        (ndf * 8, 1),
    ]
    params = []
    for cin, cout in layer_chans:
        key, kw_, kb_, ku_ = jax.random.split(key, 4)
        fan_in = cin * 4 * 4
        bound = 1.0 / (fan_in ** 0.5)
        w = jax.random.uniform(kw_, (cout, cin, 4, 4), jnp.float32, -bound, bound)
        b = jax.random.uniform(kb_, (cout,), jnp.float32, -bound, bound)
        u = jax.random.normal(ku_, (cout,), jnp.float32)
        u = u / jnp.maximum(jnp.linalg.norm(u), 1e-12)
        params.append((w, b, u))
    return params


if __name__ == "__main__":
    # Small shapes: batch=2, num_classes=4, spatial=32 (min size for 5 stride-2 convs), ndf=8.
    key = jax.random.PRNGKey(0)
    key, kx = jax.random.split(key)
    num_classes, ndf = 4, 8
    x = jax.random.normal(kx, (2, num_classes, 32, 32), jnp.float32)

    params = init_params(key, num_classes, ndf)

    forward = jax.jit(spectral_discriminator)
    out = forward(x, params)
    out = jax.block_until_ready(out)
    assert out.shape == (2, 1, 1, 1), out.shape
    print("KERNEL_OK")
</pallas_src>

<mosaic_0001>
module attributes {stable_mosaic.version = 11 : i64} {
  func.func @_gemm_bias_act_kernel(%arg0: i32, %arg1: i32, %arg2: i32, %arg3: memref<256x128xbf16, #tpu.memory_space<vmem>>, %arg4: memref<128x128xbf16, #tpu.memory_space<vmem>>, %arg5: memref<1x128xf32, #tpu.memory_space<vmem>>, %arg6: memref<256x128xf32, #tpu.memory_space<vmem>>, %arg7: memref<256x128xf32, #tpu.memory_space<vmem>>) attributes {dimension_semantics = [#tpu.dimension_semantics<parallel>, #tpu.dimension_semantics<parallel>, #tpu.dimension_semantics<arbitrary>], iteration_bounds = array<i64: 2, 1, 1>, scalar_prefetch = 0 : i64, scratch_operands = 1 : i64, tpu.core_type = #tpu.core_type<tc>, window_params = [{transform_indices = @transform_0, window_bounds = array<i64: 256, 128>}, {transform_indices = @transform_1, window_bounds = array<i64: 128, 128>}, {transform_indices = @transform_2, window_bounds = array<i64: 1, 128>}, {transform_indices = @transform_3, window_bounds = array<i64: 256, 128>}]} {
    %c0_i32 = arith.constant 0 : i32
    %0 = arith.cmpi eq, %arg2, %c0_i32 : i32
    %1 = arith.extui %0 : i1 to i32
    %c0_i32_0 = arith.constant 0 : i32
    %2 = arith.cmpi ne, %1, %c0_i32_0 : i32
    scf.if %2 {
      %cst_10 = arith.constant 0.000000e+00 : f32
      %12 = vector.broadcast %cst_10 : f32 to vector<256x128xf32>
      %c0_11 = arith.constant 0 : index
      %c0_12 = arith.constant 0 : index
      %13 = vector.load %arg7[%c0_11, %c0_12] : memref<256x128xf32, #tpu.memory_space<vmem>>, vector<256x128xf32>
      tpu.vector_store %arg7[%c0_11, %c0_12], %12 {strides = array<i32>} : memref<256x128xf32, #tpu.memory_space<vmem>>, vector<256x128xf32>,
    } else {
    }
    %c0 = arith.constant 0 : index
    %c0_1 = arith.constant 0 : index
    %3 = vector.load %arg7[%c0, %c0_1] : memref<256x128xf32, #tpu.memory_space<vmem>>, vector<256x128xf32>
    %c0_2 = arith.constant 0 : index
    %c0_3 = arith.constant 0 : index
    %4 = vector.load %arg3[%c0_2, %c0_3] : memref<256x128xbf16, #tpu.memory_space<vmem>>, vector<256x128xbf16>
    %c0_4 = arith.constant 0 : index
    %c0_5 = arith.constant 0 : index
    %5 = vector.load %arg4[%c0_4, %c0_5] : memref<128x128xbf16, #tpu.memory_space<vmem>>, vector<128x128xbf16>
    %cst = arith.constant dense<0.000000e+00> : vector<256x128xf32>
    %6 = tpu.matmul %4, %5, %cst {dimension_numbers = #tpu.dot_dimension_numbers<[1], [0], [0], [1], [0, 0, 1, 1], [], []>} : vector<256x128xbf16>, vector<128x128xbf16>, vector<256x128xf32> -> vector<256x128xf32>
    %7 = arith.addf %3, %6 : vector<256x128xf32>
    %c0_6 = arith.constant 0 : index
    %c0_7 = arith.constant 0 : index
    %8 = vector.load %arg7[%c0_6, %c0_7] : memref<256x128xf32, #tpu.memory_space<vmem>>, vector<256x128xf32>
    tpu.vector_store %arg7[%c0_6, %c0_7], %7 {strides = array<i32>} : memref<256x128xf32, #tpu.memory_space<vmem>>, vector<256x128xf32>,
    %c0_i32_8 = arith.constant 0 : i32
    %9 = arith.cmpi eq, %arg2, %c0_i32_8 : i32
    %10 = arith.extui %9 : i1 to i32
    %c0_i32_9 = arith.constant 0 : i32
    %11 = arith.cmpi ne, %10, %c0_i32_9 : i32
    scf.if %11 {
      %c0_10 = arith.constant 0 : index
      %c0_11 = arith.constant 0 : index
      %12 = vector.load %arg7[%c0_10, %c0_11] : memref<256x128xf32, #tpu.memory_space<vmem>>, vector<256x128xf32>
      %c0_12 = arith.constant 0 : index
      %c0_13 = arith.constant 0 : index
      %13 = vector.load %arg5[%c0_12, %c0_13] : memref<1x128xf32, #tpu.memory_space<vmem>>, vector<1x128xf32>
      %14 = vector.broadcast %13 : vector<1x128xf32> to vector<256x128xf32>
      %15 = arith.addf %12, %14 : vector<256x128xf32>
      %cst_14 = arith.constant 0.000000e+00 : f32
      %16 = vector.broadcast %cst_14 : f32 to vector<256x128xf32>
      %17 = arith.cmpf oge, %15, %16 : vector<256x128xf32>
      %cst_15 = arith.constant 2.000000e-01 : f32
      %18 = vector.broadcast %cst_15 : f32 to vector<256x128xf32>
      %19 = arith.mulf %15, %18 : vector<256x128xf32>
      %20 = arith.select %17, %15, %19 : vector<256x128xi1>, vector<256x128xf32>
      %c0_16 = arith.constant 0 : index
      %c0_17 = arith.constant 0 : index
      %21 = vector.load %arg6[%c0_16, %c0_17] : memref<256x128xf32, #tpu.memory_space<vmem>>, vector<256x128xf32>
      tpu.vector_store %arg6[%c0_16, %c0_17], %20 {strides = array<i32>} : memref<256x128xf32, #tpu.memory_space<vmem>>, vector<256x128xf32>,
    } else {
    }
    return
  }
  func.func @transform_0(%arg0: i32, %arg1: i32, %arg2: i32) -> (i32, i32) {
    %c0_i32 = arith.constant 0 : i32
    return %arg0, %arg2 : i32, i32
  }
  func.func @transform_1(%arg0: i32, %arg1: i32, %arg2: i32) -> (i32, i32) {
    %c0_i32 = arith.constant 0 : i32
    return %arg2, %arg1 : i32, i32
  }
  func.func @transform_2(%arg0: i32, %arg1: i32, %arg2: i32) -> (i32, i32) {
    %c0_i32 = arith.constant 0 : i32
    %c0_i32_0 = arith.constant 0 : i32
    return %c0_i32, %arg1 : i32, i32
  }
  func.func @transform_3(%arg0: i32, %arg1: i32, %arg2: i32) -> (i32, i32) {
    %c0_i32 = arith.constant 0 : i32
    return %arg0, %arg1 : i32, i32
  }
}

module attributes {stable_mosaic.version = 11 : i64} {
  func.func @_gemm_bias_act_kernel(%arg0: i32, %arg1: i32, %arg2: i32, %arg3: memref<128x128xbf16, #tpu.memory_space<vmem>>, %arg4: memref<128x128xbf16, #tpu.memory_space<vmem>>, %arg5: memref<1x128xf32, #tpu.memory_space<vmem>>, %arg6: memref<128x128xf32, #tpu.memory_space<vmem>>, %arg7: memref<128x128xf32, #tpu.memory_space<vmem>>) attributes {dimension_semantics = [#tpu.dimension_semantics<parallel>, #tpu.dimension_semantics<parallel>, #tpu.dimension_semantics<arbitrary>], iteration_bounds = array<i64: 1, 1, 1>, scalar_prefetch = 0 : i64, scratch_operands = 1 : i64, tpu.core_type = #tpu.core_type<tc>, window_params = [{transform_indices = @transform_0, window_bounds = array<i64: 128, 128>}, {transform_indices = @transform_1, window_bounds = array<i64: 128, 128>}, {transform_indices = @transform_2, window_bounds = array<i64: 1, 128>}, {transform_indices = @transform_3, window_bounds = array<i64: 128, 128>}]} {
    %c0_i32 = arith.constant 0 : i32
    %0 = arith.cmpi eq, %arg2, %c0_i32 : i32
    %1 = arith.extui %0 : i1 to i32
    %c0_i32_0 = arith.constant 0 : i32
    %2 = arith.cmpi ne, %1, %c0_i32_0 : i32
    scf.if %2 {
      %cst_10 = arith.constant 0.000000e+00 : f32
      %12 = vector.broadcast %cst_10 : f32 to vector<128x128xf32>
      %c0_11 = arith.constant 0 : index
      %c0_12 = arith.constant 0 : index
      %13 = vector.load %arg7[%c0_11, %c0_12] : memref<128x128xf32, #tpu.memory_space<vmem>>, vector<128x128xf32>
      tpu.vector_store %arg7[%c0_11, %c0_12], %12 {strides = array<i32>} : memref<128x128xf32, #tpu.memory_space<vmem>>, vector<128x128xf32>,
    } else {
    }
    %c0 = arith.constant 0 : index
    %c0_1 = arith.constant 0 : index
    %3 = vector.load %arg7[%c0, %c0_1] : memref<128x128xf32, #tpu.memory_space<vmem>>, vector<128x128xf32>
    %c0_2 = arith.constant 0 : index
    %c0_3 = arith.constant 0 : index
    %4 = vector.load %arg3[%c0_2, %c0_3] : memref<128x128xbf16, #tpu.memory_space<vmem>>, vector<128x128xbf16>
    %c0_4 = arith.constant 0 : index
    %c0_5 = arith.constant 0 : index
    %5 = vector.load %arg4[%c0_4, %c0_5] : memref<128x128xbf16, #tpu.memory_space<vmem>>, vector<128x128xbf16>
    %cst = arith.constant dense<0.000000e+00> : vector<128x128xf32>
    %6 = tpu.matmul %4, %5, %cst {dimension_numbers = #tpu.dot_dimension_numbers<[1], [0], [0], [1], [0, 0, 1, 1], [], []>} : vector<128x128xbf16>, vector<128x128xbf16>, vector<128x128xf32> -> vector<128x128xf32>
    %7 = arith.addf %3, %6 : vector<128x128xf32>
    %c0_6 = arith.constant 0 : index
    %c0_7 = arith.constant 0 : index
    %8 = vector.load %arg7[%c0_6, %c0_7] : memref<128x128xf32, #tpu.memory_space<vmem>>, vector<128x128xf32>
    tpu.vector_store %arg7[%c0_6, %c0_7], %7 {strides = array<i32>} : memref<128x128xf32, #tpu.memory_space<vmem>>, vector<128x128xf32>,
    %c0_i32_8 = arith.constant 0 : i32
    %9 = arith.cmpi eq, %arg2, %c0_i32_8 : i32
    %10 = arith.extui %9 : i1 to i32
    %c0_i32_9 = arith.constant 0 : i32
    %11 = arith.cmpi ne, %10, %c0_i32_9 : i32
    scf.if %11 {
      %c0_10 = arith.constant 0 : index
      %c0_11 = arith.constant 0 : index
      %12 = vector.load %arg7[%c0_10, %c0_11] : memref<128x128xf32, #tpu.memory_space<vmem>>, vector<128x128xf32>
      %c0_12 = arith.constant 0 : index
      %c0_13 = arith.constant 0 : index
      %13 = vector.load %arg5[%c0_12, %c0_13] : memref<1x128xf32, #tpu.memory_space<vmem>>, vector<1x128xf32>
      %14 = vector.broadcast %13 : vector<1x128xf32> to vector<128x128xf32>
      %15 = arith.addf %12, %14 : vector<128x128xf32>
      %cst_14 = arith.constant 0.000000e+00 : f32
      %16 = vector.broadcast %cst_14 : f32 to vector<128x128xf32>
      %17 = arith.cmpf oge, %15, %16 : vector<128x128xf32>
      %cst_15 = arith.constant 2.000000e-01 : f32
      %18 = vector.broadcast %cst_15 : f32 to vector<128x128xf32>
      %19 = arith.mulf %15, %18 : vector<128x128xf32>
      %20 = arith.select %17, %15, %19 : vector<128x128xi1>, vector<128x128xf32>
      %c0_16 = arith.constant 0 : index
      %c0_17 = arith.constant 0 : index
      %21 = vector.load %arg6[%c0_16, %c0_17] : memref<128x128xf32, #tpu.memory_space<vmem>>, vector<128x128xf32>
      tpu.vector_store %arg6[%c0_16, %c0_17], %20 {strides = array<i32>} : memref<128x128xf32, #tpu.memory_space<vmem>>, vector<128x128xf32>,
    } else {
    }
    return
  }
  func.func @transform_0(%arg0: i32, %arg1: i32, %arg2: i32) -> (i32, i32) {
    %c0_i32 = arith.constant 0 : i32
    return %arg0, %arg2 : i32, i32
  }
  func.func @transform_1(%arg0: i32, %arg1: i32, %arg2: i32) -> (i32, i32) {
    %c0_i32 = arith.constant 0 : i32
    return %arg2, %arg1 : i32, i32
  }
  func.func @transform_2(%arg0: i32, %arg1: i32, %arg2: i32) -> (i32, i32) {
    %c0_i32 = arith.constant 0 : i32
    %c0_i32_0 = arith.constant 0 : i32
    return %c0_i32, %arg1 : i32, i32
  }
  func.func @transform_3(%arg0: i32, %arg1: i32, %arg2: i32) -> (i32, i32) {
    %c0_i32 = arith.constant 0 : i32
    return %arg0, %arg1 : i32, i32
  }
}

module attributes {stable_mosaic.version = 11 : i64} {
  func.func @_gemm_bias_act_kernel(%arg0: i32, %arg1: i32, %arg2: i32, %arg3: memref<32x256xbf16, #tpu.memory_space<vmem>>, %arg4: memref<256x128xbf16, #tpu.memory_space<vmem>>, %arg5: memref<1x128xf32, #tpu.memory_space<vmem>>, %arg6: memref<32x128xf32, #tpu.memory_space<vmem>>, %arg7: memref<32x128xf32, #tpu.memory_space<vmem>>) attributes {dimension_semantics = [#tpu.dimension_semantics<parallel>, #tpu.dimension_semantics<parallel>, #tpu.dimension_semantics<arbitrary>], iteration_bounds = array<i64: 1, 1, 1>, scalar_prefetch = 0 : i64, scratch_operands = 1 : i64, tpu.core_type = #tpu.core_type<tc>, window_params = [{transform_indices = @transform_0, window_bounds = array<i64: 32, 256>}, {transform_indices = @transform_1, window_bounds = array<i64: 256, 128>}, {transform_indices = @transform_2, window_bounds = array<i64: 1, 128>}, {transform_indices = @transform_3, window_bounds = array<i64: 32, 128>}]} {
    %c0_i32 = arith.constant 0 : i32
    %0 = arith.cmpi eq, %arg2, %c0_i32 : i32
    %1 = arith.extui %0 : i1 to i32
    %c0_i32_0 = arith.constant 0 : i32
    %2 = arith.cmpi ne, %1, %c0_i32_0 : i32
    scf.if %2 {
      %cst_10 = arith.constant 0.000000e+00 : f32
      %12 = vector.broadcast %cst_10 : f32 to vector<32x128xf32>
      %c0_11 = arith.constant 0 : index
      %c0_12 = arith.constant 0 : index
      %13 = vector.load %arg7[%c0_11, %c0_12] : memref<32x128xf32, #tpu.memory_space<vmem>>, vector<32x128xf32>
      tpu.vector_store %arg7[%c0_11, %c0_12], %12 {strides = array<i32>} : memref<32x128xf32, #tpu.memory_space<vmem>>, vector<32x128xf32>,
    } else {
    }
    %c0 = arith.constant 0 : index
    %c0_1 = arith.constant 0 : index
    %3 = vector.load %arg7[%c0, %c0_1] : memref<32x128xf32, #tpu.memory_space<vmem>>, vector<32x128xf32>
    %c0_2 = arith.constant 0 : index
    %c0_3 = arith.constant 0 : index
    %4 = vector.load %arg3[%c0_2, %c0_3] : memref<32x256xbf16, #tpu.memory_space<vmem>>, vector<32x256xbf16>
    %c0_4 = arith.constant 0 : index
    %c0_5 = arith.constant 0 : index
    %5 = vector.load %arg4[%c0_4, %c0_5] : memref<256x128xbf16, #tpu.memory_space<vmem>>, vector<256x128xbf16>
    %cst = arith.constant dense<0.000000e+00> : vector<32x128xf32>
    %6 = tpu.matmul %4, %5, %cst {dimension_numbers = #tpu.dot_dimension_numbers<[1], [0], [0], [1], [0, 0, 1, 1], [], []>} : vector<32x256xbf16>, vector<256x128xbf16>, vector<32x128xf32> -> vector<32x128xf32>
    %7 = arith.addf %3, %6 : vector<32x128xf32>
    %c0_6 = arith.constant 0 : index
    %c0_7 = arith.constant 0 : index
    %8 = vector.load %arg7[%c0_6, %c0_7] : memref<32x128xf32, #tpu.memory_space<vmem>>, vector<32x128xf32>
    tpu.vector_store %arg7[%c0_6, %c0_7], %7 {strides = array<i32>} : memref<32x128xf32, #tpu.memory_space<vmem>>, vector<32x128xf32>,
    %c0_i32_8 = arith.constant 0 : i32
    %9 = arith.cmpi eq, %arg2, %c0_i32_8 : i32
    %10 = arith.extui %9 : i1 to i32
    %c0_i32_9 = arith.constant 0 : i32
    %11 = arith.cmpi ne, %10, %c0_i32_9 : i32
    scf.if %11 {
      %c0_10 = arith.constant 0 : index
      %c0_11 = arith.constant 0 : index
      %12 = vector.load %arg7[%c0_10, %c0_11] : memref<32x128xf32, #tpu.memory_space<vmem>>, vector<32x128xf32>
      %c0_12 = arith.constant 0 : index
      %c0_13 = arith.constant 0 : index
      %13 = vector.load %arg5[%c0_12, %c0_13] : memref<1x128xf32, #tpu.memory_space<vmem>>, vector<1x128xf32>
      %14 = vector.broadcast %13 : vector<1x128xf32> to vector<32x128xf32>
      %15 = arith.addf %12, %14 : vector<32x128xf32>
      %cst_14 = arith.constant 0.000000e+00 : f32
      %16 = vector.broadcast %cst_14 : f32 to vector<32x128xf32>
      %17 = arith.cmpf oge, %15, %16 : vector<32x128xf32>
      %cst_15 = arith.constant 2.000000e-01 : f32
      %18 = vector.broadcast %cst_15 : f32 to vector<32x128xf32>
      %19 = arith.mulf %15, %18 : vector<32x128xf32>
      %20 = arith.select %17, %15, %19 : vector<32x128xi1>, vector<32x128xf32>
      %c0_16 = arith.constant 0 : index
      %c0_17 = arith.constant 0 : index
      %21 = vector.load %arg6[%c0_16, %c0_17] : memref<32x128xf32, #tpu.memory_space<vmem>>, vector<32x128xf32>
      tpu.vector_store %arg6[%c0_16, %c0_17], %20 {strides = array<i32>} : memref<32x128xf32, #tpu.memory_space<vmem>>, vector<32x128xf32>,
    } else {
    }
    return
  }
  func.func @transform_0(%arg0: i32, %arg1: i32, %arg2: i32) -> (i32, i32) {
    %c0_i32 = arith.constant 0 : i32
    return %arg0, %arg2 : i32, i32
  }
  func.func @transform_1(%arg0: i32, %arg1: i32, %arg2: i32) -> (i32, i32) {
    %c0_i32 = arith.constant 0 : i32
    return %arg2, %arg1 : i32, i32
  }
  func.func @transform_2(%arg0: i32, %arg1: i32, %arg2: i32) -> (i32, i32) {
    %c0_i32 = arith.constant 0 : i32
    %c0_i32_0 = arith.constant 0 : i32
    return %c0_i32, %arg1 : i32, i32
  }
  func.func @transform_3(%arg0: i32, %arg1: i32, %arg2: i32) -> (i32, i32) {
    %c0_i32 = arith.constant 0 : i32
    return %arg0, %arg1 : i32, i32
  }
}

module attributes {stable_mosaic.version = 11 : i64} {
  func.func @_gemm_bias_act_kernel(%arg0: i32, %arg1: i32, %arg2: i32, %arg3: memref<16x512xbf16, #tpu.memory_space<vmem>>, %arg4: memref<512x128xbf16, #tpu.memory_space<vmem>>, %arg5: memref<1x128xf32, #tpu.memory_space<vmem>>, %arg6: memref<16x128xf32, #tpu.memory_space<vmem>>, %arg7: memref<16x128xf32, #tpu.memory_space<vmem>>) attributes {dimension_semantics = [#tpu.dimension_semantics<parallel>, #tpu.dimension_semantics<parallel>, #tpu.dimension_semantics<arbitrary>], iteration_bounds = array<i64: 1, 1, 1>, scalar_prefetch = 0 : i64, scratch_operands = 1 : i64, tpu.core_type = #tpu.core_type<tc>, window_params = [{transform_indices = @transform_0, window_bounds = array<i64: 16, 512>}, {transform_indices = @transform_1, window_bounds = array<i64: 512, 128>}, {transform_indices = @transform_2, window_bounds = array<i64: 1, 128>}, {transform_indices = @transform_3, window_bounds = array<i64: 16, 128>}]} {
    %c0_i32 = arith.constant 0 : i32
    %0 = arith.cmpi eq, %arg2, %c0_i32 : i32
    %1 = arith.extui %0 : i1 to i32
    %c0_i32_0 = arith.constant 0 : i32
    %2 = arith.cmpi ne, %1, %c0_i32_0 : i32
    scf.if %2 {
      %cst_10 = arith.constant 0.000000e+00 : f32
      %12 = vector.broadcast %cst_10 : f32 to vector<16x128xf32>
      %c0_11 = arith.constant 0 : index
      %c0_12 = arith.constant 0 : index
      %13 = vector.load %arg7[%c0_11, %c0_12] : memref<16x128xf32, #tpu.memory_space<vmem>>, vector<16x128xf32>
      tpu.vector_store %arg7[%c0_11, %c0_12], %12 {strides = array<i32>} : memref<16x128xf32, #tpu.memory_space<vmem>>, vector<16x128xf32>,
    } else {
    }
    %c0 = arith.constant 0 : index
    %c0_1 = arith.constant 0 : index
    %3 = vector.load %arg7[%c0, %c0_1] : memref<16x128xf32, #tpu.memory_space<vmem>>, vector<16x128xf32>
    %c0_2 = arith.constant 0 : index
    %c0_3 = arith.constant 0 : index
    %4 = vector.load %arg3[%c0_2, %c0_3] : memref<16x512xbf16, #tpu.memory_space<vmem>>, vector<16x512xbf16>
    %c0_4 = arith.constant 0 : index
    %c0_5 = arith.constant 0 : index
    %5 = vector.load %arg4[%c0_4, %c0_5] : memref<512x128xbf16, #tpu.memory_space<vmem>>, vector<512x128xbf16>
    %cst = arith.constant dense<0.000000e+00> : vector<16x128xf32>
    %6 = tpu.matmul %4, %5, %cst {dimension_numbers = #tpu.dot_dimension_numbers<[1], [0], [0], [1], [0, 0, 1, 1], [], []>} : vector<16x512xbf16>, vector<512x128xbf16>, vector<16x128xf32> -> vector<16x128xf32>
    %7 = arith.addf %3, %6 : vector<16x128xf32>
    %c0_6 = arith.constant 0 : index
    %c0_7 = arith.constant 0 : index
    %8 = vector.load %arg7[%c0_6, %c0_7] : memref<16x128xf32, #tpu.memory_space<vmem>>, vector<16x128xf32>
    tpu.vector_store %arg7[%c0_6, %c0_7], %7 {strides = array<i32>} : memref<16x128xf32, #tpu.memory_space<vmem>>, vector<16x128xf32>,
    %c0_i32_8 = arith.constant 0 : i32
    %9 = arith.cmpi eq, %arg2, %c0_i32_8 : i32
    %10 = arith.extui %9 : i1 to i32
    %c0_i32_9 = arith.constant 0 : i32
    %11 = arith.cmpi ne, %10, %c0_i32_9 : i32
    scf.if %11 {
      %c0_10 = arith.constant 0 : index
      %c0_11 = arith.constant 0 : index
      %12 = vector.load %arg7[%c0_10, %c0_11] : memref<16x128xf32, #tpu.memory_space<vmem>>, vector<16x128xf32>
      %c0_12 = arith.constant 0 : index
      %c0_13 = arith.constant 0 : index
      %13 = vector.load %arg5[%c0_12, %c0_13] : memref<1x128xf32, #tpu.memory_space<vmem>>, vector<1x128xf32>
      %14 = vector.broadcast %13 : vector<1x128xf32> to vector<16x128xf32>
      %15 = arith.addf %12, %14 : vector<16x128xf32>
      %cst_14 = arith.constant 0.000000e+00 : f32
      %16 = vector.broadcast %cst_14 : f32 to vector<16x128xf32>
      %17 = arith.cmpf oge, %15, %16 : vector<16x128xf32>
      %cst_15 = arith.constant 2.000000e-01 : f32
      %18 = vector.broadcast %cst_15 : f32 to vector<16x128xf32>
      %19 = arith.mulf %15, %18 : vector<16x128xf32>
      %20 = arith.select %17, %15, %19 : vector<16x128xi1>, vector<16x128xf32>
      %c0_16 = arith.constant 0 : index
      %c0_17 = arith.constant 0 : index
      %21 = vector.load %arg6[%c0_16, %c0_17] : memref<16x128xf32, #tpu.memory_space<vmem>>, vector<16x128xf32>
      tpu.vector_store %arg6[%c0_16, %c0_17], %20 {strides = array<i32>} : memref<16x128xf32, #tpu.memory_space<vmem>>, vector<16x128xf32>,
    } else {
    }
    return
  }
  func.func @transform_0(%arg0: i32, %arg1: i32, %arg2: i32) -> (i32, i32) {
    %c0_i32 = arith.constant 0 : i32
    return %arg0, %arg2 : i32, i32
  }
  func.func @transform_1(%arg0: i32, %arg1: i32, %arg2: i32) -> (i32, i32) {
    %c0_i32 = arith.constant 0 : i32
    return %arg2, %arg1 : i32, i32
  }
  func.func @transform_2(%arg0: i32, %arg1: i32, %arg2: i32) -> (i32, i32) {
    %c0_i32 = arith.constant 0 : i32
    %c0_i32_0 = arith.constant 0 : i32
    return %c0_i32, %arg1 : i32, i32
  }
  func.func @transform_3(%arg0: i32, %arg1: i32, %arg2: i32) -> (i32, i32) {
    %c0_i32 = arith.constant 0 : i32
    return %arg0, %arg1 : i32, i32
  }
}

module attributes {stable_mosaic.version = 11 : i64} {
  func.func @_gemm_bias_act_kernel(%arg0: i32, %arg1: i32, %arg2: i32, %arg3: memref<16x512xbf16, #tpu.memory_space<vmem>>, %arg4: memref<512x128xbf16, #tpu.memory_space<vmem>>, %arg5: memref<1x128xf32, #tpu.memory_space<vmem>>, %arg6: memref<16x128xf32, #tpu.memory_space<vmem>>, %arg7: memref<16x128xf32, #tpu.memory_space<vmem>>) attributes {dimension_semantics = [#tpu.dimension_semantics<parallel>, #tpu.dimension_semantics<parallel>, #tpu.dimension_semantics<arbitrary>], iteration_bounds = array<i64: 1, 1, 2>, scalar_prefetch = 0 : i64, scratch_operands = 1 : i64, tpu.core_type = #tpu.core_type<tc>, window_params = [{transform_indices = @transform_0, window_bounds = array<i64: 16, 512>}, {transform_indices = @transform_1, window_bounds = array<i64: 512, 128>}, {transform_indices = @transform_2, window_bounds = array<i64: 1, 128>}, {transform_indices = @transform_3, window_bounds = array<i64: 16, 128>}]} {
    %c0_i32 = arith.constant 0 : i32
    %0 = arith.cmpi eq, %arg2, %c0_i32 : i32
    %1 = arith.extui %0 : i1 to i32
    %c0_i32_0 = arith.constant 0 : i32
    %2 = arith.cmpi ne, %1, %c0_i32_0 : i32
    scf.if %2 {
      %cst_9 = arith.constant 0.000000e+00 : f32
      %12 = vector.broadcast %cst_9 : f32 to vector<16x128xf32>
      %c0_10 = arith.constant 0 : index
      %c0_11 = arith.constant 0 : index
      %13 = vector.load %arg7[%c0_10, %c0_11] : memref<16x128xf32, #tpu.memory_space<vmem>>, vector<16x128xf32>
      tpu.vector_store %arg7[%c0_10, %c0_11], %12 {strides = array<i32>} : memref<16x128xf32, #tpu.memory_space<vmem>>, vector<16x128xf32>,
    } else {
    }
    %c0 = arith.constant 0 : index
    %c0_1 = arith.constant 0 : index
    %3 = vector.load %arg7[%c0, %c0_1] : memref<16x128xf32, #tpu.memory_space<vmem>>, vector<16x128xf32>
    %c0_2 = arith.constant 0 : index
    %c0_3 = arith.constant 0 : index
    %4 = vector.load %arg3[%c0_2, %c0_3] : memref<16x512xbf16, #tpu.memory_space<vmem>>, vector<16x512xbf16>
    %c0_4 = arith.constant 0 : index
    %c0_5 = arith.constant 0 : index
    %5 = vector.load %arg4[%c0_4, %c0_5] : memref<512x128xbf16, #tpu.memory_space<vmem>>, vector<512x128xbf16>
    %cst = arith.constant dense<0.000000e+00> : vector<16x128xf32>
    %6 = tpu.matmul %4, %5, %cst {dimension_numbers = #tpu.dot_dimension_numbers<[1], [0], [0], [1], [0, 0, 1, 1], [], []>} : vector<16x512xbf16>, vector<512x128xbf16>, vector<16x128xf32> -> vector<16x128xf32>
    %7 = arith.addf %3, %6 : vector<16x128xf32>
    %c0_6 = arith.constant 0 : index
    %c0_7 = arith.constant 0 : index
    %8 = vector.load %arg7[%c0_6, %c0_7] : memref<16x128xf32, #tpu.memory_space<vmem>>, vector<16x128xf32>
    tpu.vector_store %arg7[%c0_6, %c0_7], %7 {strides = array<i32>} : memref<16x128xf32, #tpu.memory_space<vmem>>, vector<16x128xf32>,
    %c1_i32 = arith.constant 1 : i32
    %9 = arith.cmpi eq, %arg2, %c1_i32 : i32
    %10 = arith.extui %9 : i1 to i32
    %c0_i32_8 = arith.constant 0 : i32
    %11 = arith.cmpi ne, %10, %c0_i32_8 : i32
    scf.if %11 {
      %c0_9 = arith.constant 0 : index
      %c0_10 = arith.constant 0 : index
      %12 = vector.load %arg7[%c0_9, %c0_10] : memref<16x128xf32, #tpu.memory_space<vmem>>, vector<16x128xf32>
      %c0_11 = arith.constant 0 : index
      %c0_12 = arith.constant 0 : index
      %13 = vector.load %arg5[%c0_11, %c0_12] : memref<1x128xf32, #tpu.memory_space<vmem>>, vector<1x128xf32>
      %14 = vector.broadcast %13 : vector<1x128xf32> to vector<16x128xf32>
      %15 = arith.addf %12, %14 : vector<16x128xf32>
      %c0_13 = arith.constant 0 : index
      %c0_14 = arith.constant 0 : index
      %16 = vector.load %arg6[%c0_13, %c0_14] : memref<16x128xf32, #tpu.memory_space<vmem>>, vector<16x128xf32>
      tpu.vector_store %arg6[%c0_13, %c0_14], %15 {strides = array<i32>} : memref<16x128xf32, #tpu.memory_space<vmem>>, vector<16x128xf32>,
    } else {
    }
    return
  }
  func.func @transform_0(%arg0: i32, %arg1: i32, %arg2: i32) -> (i32, i32) {
    %c0_i32 = arith.constant 0 : i32
    return %arg0, %arg2 : i32, i32
  }
  func.func @transform_1(%arg0: i32, %arg1: i32, %arg2: i32) -> (i32, i32) {
    %c0_i32 = arith.constant 0 : i32
    return %arg2, %arg1 : i32, i32
  }
  func.func @transform_2(%arg0: i32, %arg1: i32, %arg2: i32) -> (i32, i32) {
    %c0_i32 = arith.constant 0 : i32
    %c0_i32_0 = arith.constant 0 : i32
    return %c0_i32, %arg1 : i32, i32
  }
  func.func @transform_3(%arg0: i32, %arg1: i32, %arg2: i32) -> (i32, i32) {
    %c0_i32 = arith.constant 0 : i32
    return %arg0, %arg1 : i32, i32
  }
}

</mosaic_0001>

<bundles_post_ra>
// kernel: spectral_discriminator.5
= control target key start
LH: loop header
LB: loop body
LE: loop exit
PB: predicated region body
PF: predicated region fallthrough
CT: control target
= control target key end

     0   :  { %s1276_s12 = smov 0   ;;  %s1278_s13 = smov 0   ;;  %s1426_s0 = inlined_call_operand.vmem [shape: bf16[512,128], index: 0, kind: input, shape index: {}]   ;;  %s1427_s1 = inlined_call_operand.vmem [shape: bf16[128,128], index: 1, kind: input, shape index: {}]   ;;  %s1428_s2 = inlined_call_operand.vmem [shape: f32[1,128], index: 2, kind: input, shape index: {}]   ;;  %s1429_s3 = inlined_call_operand.vmem [shape: f32[512,128], index: 3, kind: output, shape index: {}]  }
   0x1   :  { %s1280_s14 = smov 0  }
   0x2 LB: > { %s32_s15 = sadd.s32 1, %s1250_s13  ;;  %p1064_p0 = scmp.ge.s32.totalorder %s1254_s14, 1  ;;  %s1254_s14 = sphi %s1280_s14, %s13_s14   ;;  %s1250_s13 = sphi %s1278_s13, %s1431_s13   ;;  %s1246_s12 = sphi %s1276_s12, %s1430_s12  }
   0x3   : > { %p34_p1 = scmp.ge.s32.totalorder %s32_s15, 2  ;;  %p188_p2 = scmp.lt.s32.totalorder %s1254_s14, 3 }
   0x5   : > { %s1433_s15 = smov (%p34_p1, %s32_s15), 0  ;;  %p189_p3 = pnand %p1064_p0, %p188_p2 }
   0x6   : > { %v1208_v0 = vld [vmem:[%s1427_s1] sm:$0xff] (!%p189_p3)   ;;  %s1065_s18 = sshll.u32 (!%p189_p3), %s1246_s12, 5  ;;  %v1209_v1 = vld [vmem:[%s1427_s1 + $0x8] sm:$0xff] (!%p189_p3)   ;;  %v1210_v2 = vld [vmem:[%s1427_s1 + $0x10] sm:$0xff] (!%p189_p3)  }
   0x7   : > { %192 = sbr.rel (%p189_p3) target bundleno = 288 (0x120), region = 32  ;;  %p230_p4 = scmp.lt.s32.totalorder (!%p189_p3), %s1065_s18, 63  ;;  %1120 = vmatprep.subr.bf16.mxu0 (!%p189_p3), %v1208_v0  ;;  %1168 = vmatprep.subr.bf16.mxu1 (!%p189_p3), %v1208_v0  ;;  %v1211_v3 = vld [vmem:[%s1427_s1 + $0x18] sm:$0xff] (!%p189_p3)   ;;  %v1212_v6 = vld [vmem:[%s1427_s1 + $0x20] sm:$0xff] (!%p189_p3)   ;;  %v1213_v7 = vld [vmem:[%s1427_s1 + $0x28] sm:$0xff] (!%p189_p3)  }
   0x8   : > { %1121 = vmatpush3.bf16.msra.mxu0 (!%p189_p3), %v1208_v0  ;;  %1176 = vmatpush3.bf16.msra.mxu1 (!%p189_p3), %v1208_v0  ;;  %v1214_v8 = vld [vmem:[%s1427_s1 + $0x30] sm:$0xff] (!%p189_p3)   ;;  %v1215_v9 = vld [vmem:[%s1427_s1 + $0x38] sm:$0xff] (!%p189_p3)   ;;  %v1345_v24 = vld [vmem:[%s1428_s2] ss:$0 sm:$0xff] (!%p189_p3) }
   0x9   : > { %1122 = vmatprep.subr.bf16.mxu0 (!%p189_p3), %v1209_v1  ;;  %1169 = vmatprep.subr.bf16.mxu1 (!%p189_p3), %v1209_v1 }
   0xc   : > { %1123 = vmatpush3.bf16.msra.mxu0 (!%p189_p3), %v1209_v1  ;;  %1177 = vmatpush3.bf16.msra.mxu1 (!%p189_p3), %v1209_v1 }
   0xd   : > { %1124 = vmatprep.subr.bf16.mxu0 (!%p189_p3), %v1210_v2  ;;  %1170 = vmatprep.subr.bf16.mxu1 (!%p189_p3), %v1210_v2 }
   0xe   : > { %s1435_s18 = smov (!%p230_p4, %s1065_s18), 63 }
   0xf   : > { %s1066_s23 = sshll.u32 %s1435_s18, 2  ;;  %s1068_s12 = sshll.u32 %s1435_s18, 3 }
  0x10   : > { %s1309_s26 = scalar_lea.vmem %s1426_s0, %s1066_s23  ;;  %1125 = vmatpush3.bf16.msra.mxu0 %v1210_v2  ;;  %1178 = vmatpush3.bf16.msra.mxu1 %v1210_v2  ;;  %s1355_s19 = scalar_lea.vmem %s1429_s3, %s1068_s12 }
  0x11   : > { %v1216_v4 = vld [vmem:[%s1309_s26] sm:$0xff]   ;;  %1126 = vmatprep.subr.bf16.mxu0 %v1211_v3  ;;  %1171 = vmatprep.subr.bf16.mxu1 %v1211_v3  ;;  %v1218_v10 = vld [vmem:[%s1309_s26 + $0x8] sm:$0xff]   ;;  %v1220_v12 = vld [vmem:[%s1309_s26 + $0x10] sm:$0xff]  }
  0x12   : > { %v1217_v5 = vld [vmem:[%s1309_s26 + $0x40] sm:$0xff]   ;;  %1136 = vmatprep.mubr.bf16.mxu0 %v1216_v4  ;;  %v1219_v11 = vld [vmem:[%s1309_s26 + $0x48] sm:$0xff]   ;;  %v1221_v13 = vld [vmem:[%s1309_s26 + $0x50] sm:$0xff]  }
  0x13   : > { %1152 = vmatprep.mubr.bf16.mxu1 %v1217_v5  ;;  %v1222_v14 = vld [vmem:[%s1309_s26 + $0x18] sm:$0xff]   ;;  %v1224_v16 = vld [vmem:[%s1309_s26 + $0x20] sm:$0xff]   ;;  %v1226_v18 = vld [vmem:[%s1309_s26 + $0x28] sm:$0xff]  }
  0x14   : > { %1127 = vmatpush3.bf16.msra.mxu0 %v1211_v3  ;;  %1179 = vmatpush3.bf16.msra.mxu1 %v1211_v3  ;;  %v1223_v15 = vld [vmem:[%s1309_s26 + $0x58] sm:$0xff]   ;;  %v1225_v17 = vld [vmem:[%s1309_s26 + $0x60] sm:$0xff]   ;;  %v1227_v19 = vld [vmem:[%s1309_s26 + $0x68] sm:$0xff]  }
  0x15   : > { %1128 = vmatprep.subr.bf16.mxu0 %v1212_v6  ;;  %1172 = vmatprep.subr.bf16.mxu1 %v1212_v6  ;;  %v1228_v20 = vld [vmem:[%s1309_s26 + $0x30] sm:$0xff]   ;;  %v1230_v22 = vld [vmem:[%s1309_s26 + $0x38] sm:$0xff]  }
  0x16   : > { %v1229_v21 = vld [vmem:[%s1309_s26 + $0x70] sm:$0xff]   ;;  %v1231_v23 = vld [vmem:[%s1309_s26 + $0x78] sm:$0xff]  }
  0x18   : > { %1129 = vmatpush3.bf16.msra.mxu0 %v1212_v6  ;;  %1180 = vmatpush3.bf16.msra.mxu1 %v1212_v6 }
  0x19   : > { %1130 = vmatprep.subr.bf16.mxu0 %v1213_v7  ;;  %1173 = vmatprep.subr.bf16.mxu1 %v1213_v7 }
  0x1c   : > { %1131 = vmatpush3.bf16.msra.mxu0 %v1213_v7  ;;  %1181 = vmatpush3.bf16.msra.mxu1 %v1213_v7 }
  0x1d   : > { %1132 = vmatprep.subr.bf16.mxu0 %v1214_v8  ;;  %1174 = vmatprep.subr.bf16.mxu1 %v1214_v8 }
  0x20   : > { %1133 = vmatpush3.bf16.msra.mxu0 %v1214_v8  ;;  %1182 = vmatpush3.bf16.msra.mxu1 %v1214_v8 }
  0x21   : > { %1134 = vmatprep.subr.bf16.mxu0 %v1215_v9  ;;  %1175 = vmatprep.subr.bf16.mxu1 %v1215_v9 }
  0x24   : > { %1135 = vmatpush3.bf16.msra.mxu0 %v1215_v9  ;;  %1183 = vmatpush3.bf16.msra.mxu1 %v1215_v9 }
  0x27   : > { %1137 = vmatmul.mubr.bf16.vlgmr.msra.gmra.mrb[0].mxu0 %v1218_v10  ;;  %1153 = vmatmul.mubr.bf16.vlgmr.msra.gmra.mrb[0].mxu1 %v1219_v11 }
  0x28   : > { %1140 = vmatprep.mubr.bf16.mxu0 %v1220_v12  ;;  %1156 = vmatprep.mubr.bf16.mxu1 %v1221_v13 }
  0x2f   : > { %1141 = vmatmul.mubr.bf16.gmra.mrb[4].mxu0 %v1222_v14  ;;  %1157 = vmatmul.mubr.bf16.gmra.mrb[4].mxu1 %v1223_v15 }
  0x30   : > { %1144 = vmatprep.mubr.bf16.mxu0 %v1224_v16  ;;  %1160 = vmatprep.mubr.bf16.mxu1 %v1225_v17 }
  0x37   : > { %1145 = vmatmul.mubr.bf16.gmra.mrb[8].mxu0 %v1226_v18  ;;  %1161 = vmatmul.mubr.bf16.gmra.mrb[8].mxu1 %v1227_v19 }
  0x38   : > { %1148 = vmatprep.mubr.bf16.mxu0 %v1228_v20  ;;  %1164 = vmatprep.mubr.bf16.mxu1 %v1229_v21 }
  0x3f   : > { %1149 = vmatmul.mubr.bf16.gmra.mrb[12].mxu0 %v1230_v22  ;;  %1165 = vmatmul.mubr.bf16.gmra.mrb[12].mxu1 %v1231_v23 }
  0xfa   : > { %v1138_v25 = vpop.f32.mrb[0].mxu0  ;;  %v1154_v26 = vpop.f32.mrb[0].mxu1 }
  0xfb   : > { %v789_v27 = vadd.f32 %v1138_v25, %v1345_v24  ;;  %v805_v28 = vadd.f32 %v1154_v26, %v1345_v24  ;;  %v554_v29 = vpop.f32.mrb[1].mxu0  ;;  %v618_v30 = vpop.f32.mrb[1].mxu1 }
  0xfc   : > { %v787_v31 = vadd.f32 %v1345_v24, %v554_v29  ;;  %v803_v32 = vadd.f32 %v1345_v24, %v618_v30  ;;  %v1139_v33 = vpop.f32.mrb[2].mxu0  ;;  %v1155_v34 = vpop.f32.mrb[2].mxu1 }
  0xfd   : > { %vm821_vm0 = vcmp.ge.f32.partialorder %v789_v27, 0.0  ;;  %v853_v35 = vmul.f32 0.2, %v789_v27  ;;  %vm837_vm1 = vcmp.ge.f32.partialorder %v805_v28, 0.0  ;;  %v869_v36 = vmul.f32 0.2, %v805_v28 }
  0xfe   : > { %vm819_vm2 = vcmp.ge.f32.partialorder %v787_v31, 0.0  ;;  %v851_v37 = vmul.f32 0.2, %v787_v31  ;;  %vm835_vm3 = vcmp.ge.f32.partialorder %v803_v32, 0.0  ;;  %v867_v38 = vmul.f32 0.2, %v803_v32 }
  0xff   : > { %v885_v39 = vsel %vm821_vm0, %v789_v27, %v853_v35  ;;  %v901_v40 = vsel %vm837_vm1, %v805_v28, %v869_v36  ;;  %v790_v41 = vadd.f32 %v1139_v33, %v1345_v24  ;;  %v806_v42 = vadd.f32 %v1155_v34, %v1345_v24  ;;  %v557_v43 = vpop.f32.mrb[3].mxu0  ;;  %v621_v44 = vpop.f32.mrb[3].mxu1 }
 0x100   : > { %917 = vst [vmem:[%s1355_s19 + $0x10] sm:$0xff] %v885_v39  ;;  %933 = vst [vmem:[%s1355_s19 + $0x90] sm:$0xff] %v901_v40  ;;  %v883_v45 = vsel %vm819_vm2, %v787_v31, %v851_v37  ;;  %v899_v46 = vsel %vm835_vm3, %v803_v32, %v867_v38  ;;  %v788_v47 = vadd.f32 %v1345_v24, %v557_v43 }
 0x101   : > { %v804_v48 = vadd.f32 %v1345_v24, %v621_v44  ;;  %915 = vst [vmem:[%s1355_s19] sm:$0xff] %v883_v45  ;;  %931 = vst [vmem:[%s1355_s19 + $0x80] sm:$0xff] %v899_v46  ;;  %vm822_vm4 = vcmp.ge.f32.partialorder %v790_v41, 0.0  ;;  %v854_v49 = vmul.f32 0.2, %v790_v41  ;;  %vm838_vm5 = vcmp.ge.f32.partialorder %v806_v42, 0.0 }
 0x102   : > { %v870_v50 = vmul.f32 0.2, %v806_v42  ;;  %vm820_vm6 = vcmp.ge.f32.partialorder %v788_v47, 0.0  ;;  %v852_v51 = vmul.f32 0.2, %v788_v47  ;;  %v1142_v55 = vpop.f32.mrb[4].mxu0 }
 0x103   : > { %vm836_vm7 = vcmp.ge.f32.partialorder %v804_v48, 0.0  ;;  %v868_v52 = vmul.f32 0.2, %v804_v48  ;;  %v886_v53 = vsel %vm822_vm4, %v790_v41, %v854_v49  ;;  %v1158_v56 = vpop.f32.mrb[4].mxu1  ;;  %v793_v59 = vadd.f32 %v1142_v55, %v1345_v24  ;;  %v570_v61 = vpop.f32.mrb[5].mxu0 }
 0x104   : > { %v902_v54 = vsel %vm838_vm5, %v806_v42, %v870_v50  ;;  %918 = vst [vmem:[%s1355_s19 + $0x18] sm:$0xff] %v886_v53  ;;  %v884_v57 = vsel %vm820_vm6, %v788_v47, %v852_v51  ;;  %v809_v60 = vadd.f32 %v1158_v56, %v1345_v24  ;;  %v634_v62 = vpop.f32.mrb[5].mxu1  ;;  %v791_v63 = vadd.f32 %v1345_v24, %v570_v61  ;;  %v1143_v1 = vpop.f32.mrb[6].mxu0 }
 0x105   : > { %934 = vst [vmem:[%s1355_s19 + $0x98] sm:$0xff] %v902_v54  ;;  %v900_v58 = vsel %vm836_vm7, %v804_v48, %v868_v52  ;;  %916 = vst [vmem:[%s1355_s19 + $0x8] sm:$0xff] %v884_v57  ;;  %v807_v0 = vadd.f32 %v1345_v24, %v634_v62  ;;  %v1159_v2 = vpop.f32.mrb[6].mxu1  ;;  %vm825_vm8 = vcmp.ge.f32.partialorder %v793_v59, 0.0  ;;  %v857_v3 = vmul.f32 0.2, %v793_v59 }
 0x106   : > { %932 = vst [vmem:[%s1355_s19 + $0x88] sm:$0xff] %v900_v58  ;;  %vm841_vm9 = vcmp.ge.f32.partialorder %v809_v60, 0.0  ;;  %v873_v4 = vmul.f32 0.2, %v809_v60  ;;  %vm823_vm10 = vcmp.ge.f32.partialorder %v791_v63, 0.0  ;;  %v794_v9 = vadd.f32 %v1143_v1, %v1345_v24  ;;  %v573_v11 = vpop.f32.mrb[7].mxu0 }
 0x107   : > { %v855_v5 = vmul.f32 0.2, %v791_v63  ;;  %vm839_vm11 = vcmp.ge.f32.partialorder %v807_v0, 0.0  ;;  %v871_v6 = vmul.f32 0.2, %v807_v0  ;;  %v889_v7 = vsel %vm825_vm8, %v793_v59, %v857_v3  ;;  %v637_v12 = vpop.f32.mrb[7].mxu1 }
 0x108   : > { %v905_v8 = vsel %vm841_vm9, %v809_v60, %v873_v4  ;;  %v810_v10 = vadd.f32 %v1159_v2, %v1345_v24  ;;  %921 = vst [vmem:[%s1355_s19 + $0x30] sm:$0xff] %v889_v7  ;;  %v792_v15 = vadd.f32 %v1345_v24, %v573_v11  ;;  %v808_v16 = vadd.f32 %v1345_v24, %v637_v12 }
 0x109   : > { %937 = vst [vmem:[%s1355_s19 + $0xb0] sm:$0xff] %v905_v8  ;;  %v887_v13 = vsel %vm823_vm10, %v791_v63, %v855_v5  ;;  %v903_v14 = vsel %vm839_vm11, %v807_v0, %v871_v6  ;;  %vm826_vm12 = vcmp.ge.f32.partialorder %v794_v9, 0.0  ;;  %v858_v17 = vmul.f32 0.2, %v794_v9 }
 0x10a   : > { %919 = vst [vmem:[%s1355_s19 + $0x20] sm:$0xff] %v887_v13  ;;  %935 = vst [vmem:[%s1355_s19 + $0xa0] sm:$0xff] %v903_v14  ;;  %vm842_vm13 = vcmp.ge.f32.partialorder %v810_v10, 0.0  ;;  %v874_v18 = vmul.f32 0.2, %v810_v10  ;;  %vm824_vm14 = vcmp.ge.f32.partialorder %v792_v15, 0.0 }
 0x10b   : > { %v856_v19 = vmul.f32 0.2, %v792_v15  ;;  %vm840_vm15 = vcmp.ge.f32.partialorder %v808_v16, 0.0  ;;  %v872_v20 = vmul.f32 0.2, %v808_v16  ;;  %v890_v21 = vsel %vm826_vm12, %v794_v9, %v858_v17  ;;  %v1146_v23 = vpop.f32.mrb[8].mxu0 }
 0x10c   : > { %v906_v22 = vsel %vm842_vm13, %v810_v10, %v874_v18  ;;  %v1162_v25 = vpop.f32.mrb[8].mxu1  ;;  %922 = vst [vmem:[%s1355_s19 + $0x38] sm:$0xff] %v890_v21  ;;  %v797_v28 = vadd.f32 %v1146_v23, %v1345_v24  ;;  %v586_v30 = vpop.f32.mrb[9].mxu0 }
 0x10d   : > { %938 = vst [vmem:[%s1355_s19 + $0xb8] sm:$0xff] %v906_v22  ;;  %v888_v26 = vsel %vm824_vm14, %v792_v15, %v856_v19  ;;  %v904_v27 = vsel %vm840_vm15, %v808_v16, %v872_v20  ;;  %v813_v29 = vadd.f32 %v1162_v25, %v1345_v24  ;;  %v650_v31 = vpop.f32.mrb[9].mxu1  ;;  %v795_v32 = vadd.f32 %v1345_v24, %v586_v30  ;;  %v1147_v34 = vpop.f32.mrb[10].mxu0 }
 0x10e   : > { %920 = vst [vmem:[%s1355_s19 + $0x28] sm:$0xff] %v888_v26  ;;  %936 = vst [vmem:[%s1355_s19 + $0xa8] sm:$0xff] %v904_v27  ;;  %v811_v33 = vadd.f32 %v1345_v24, %v650_v31  ;;  %v1163_v35 = vpop.f32.mrb[10].mxu1  ;;  %vm829_vm0 = vcmp.ge.f32.partialorder %v797_v28, 0.0  ;;  %v861_v36 = vmul.f32 0.2, %v797_v28  ;;  %v798_v42 = vadd.f32 %v1147_v34, %v1345_v24 }
 0x10f   : > { %vm845_vm1 = vcmp.ge.f32.partialorder %v813_v29, 0.0  ;;  %v877_v37 = vmul.f32 0.2, %v813_v29  ;;  %vm827_vm2 = vcmp.ge.f32.partialorder %v795_v32, 0.0  ;;  %v859_v38 = vmul.f32 0.2, %v795_v32 }
 0x110   : > { %vm843_vm3 = vcmp.ge.f32.partialorder %v811_v33, 0.0  ;;  %v875_v39 = vmul.f32 0.2, %v811_v33  ;;  %v893_v40 = vsel %vm829_vm0, %v797_v28, %v861_v36  ;;  %v814_v43 = vadd.f32 %v1163_v35, %v1345_v24  ;;  %v589_v44 = vpop.f32.mrb[11].mxu0  ;;  %v653_v45 = vpop.f32.mrb[11].mxu1 }
 0x111   : > { %v909_v41 = vsel %vm845_vm1, %v813_v29, %v877_v37  ;;  %925 = vst [vmem:[%s1355_s19 + $0x50] sm:$0xff] %v893_v40  ;;  %v891_v46 = vsel %vm827_vm2, %v795_v32, %v859_v38  ;;  %v796_v48 = vadd.f32 %v1345_v24, %v589_v44  ;;  %v812_v49 = vadd.f32 %v1345_v24, %v653_v45 }
 0x112   : > { %941 = vst [vmem:[%s1355_s19 + $0xd0] sm:$0xff] %v909_v41  ;;  %v907_v47 = vsel %vm843_vm3, %v811_v33, %v875_v39  ;;  %v1150_v50 = vpop.f32.mrb[12].mxu0  ;;  %v1166_v51 = vpop.f32.mrb[12].mxu1  ;;  %923 = vst [vmem:[%s1355_s19 + $0x40] sm:$0xff] %v891_v46  ;;  %vm830_vm4 = vcmp.ge.f32.partialorder %v798_v42, 0.0  ;;  %vm846_vm5 = vcmp.ge.f32.partialorder %v814_v43, 0.0 }
 0x113   : > { %939 = vst [vmem:[%s1355_s19 + $0xc0] sm:$0xff] %v907_v47  ;;  %v862_v52 = vmul.f32 0.2, %v798_v42  ;;  %v878_v53 = vmul.f32 0.2, %v814_v43  ;;  %vm828_vm6 = vcmp.ge.f32.partialorder %v796_v48, 0.0  ;;  %v801_v58 = vadd.f32 %v1150_v50, %v1345_v24 }
 0x114   : > { %v860_v54 = vmul.f32 0.2, %v796_v48  ;;  %vm844_vm7 = vcmp.ge.f32.partialorder %v812_v49, 0.0  ;;  %v876_v55 = vmul.f32 0.2, %v812_v49  ;;  %v817_v59 = vadd.f32 %v1166_v51, %v1345_v24  ;;  %v602_v60 = vpop.f32.mrb[13].mxu0 }
 0x115   : > { %v894_v56 = vsel %vm830_vm4, %v798_v42, %v862_v52  ;;  %v910_v57 = vsel %vm846_vm5, %v814_v43, %v878_v53  ;;  %v666_v61 = vpop.f32.mrb[13].mxu1  ;;  %v799_v0 = vadd.f32 %v1345_v24, %v602_v60  ;;  %v1151_v2 = vpop.f32.mrb[14].mxu0  ;;  %vm833_vm8 = vcmp.ge.f32.partialorder %v801_v58, 0.0 }
 0x116   : > { %926 = vst [vmem:[%s1355_s19 + $0x58] sm:$0xff] %v894_v56  ;;  %942 = vst [vmem:[%s1355_s19 + $0xd8] sm:$0xff] %v910_v57  ;;  %v892_v62 = vsel %vm828_vm6, %v796_v48, %v860_v54  ;;  %v908_v63 = vsel %vm844_vm7, %v812_v49, %v876_v55  ;;  %v815_v1 = vadd.f32 %v1345_v24, %v666_v61  ;;  %v1167_v3 = vpop.f32.mrb[14].mxu1  ;;  %v865_v4 = vmul.f32 0.2, %v801_v58  ;;  %v605_v12 = vpop.f32.mrb[15].mxu0 }
 0x117   : > { %924 = vst [vmem:[%s1355_s19 + $0x48] sm:$0xff] %v892_v62  ;;  %940 = vst [vmem:[%s1355_s19 + $0xc8] sm:$0xff] %v908_v63  ;;  %vm849_vm9 = vcmp.ge.f32.partialorder %v817_v59, 0.0  ;;  %v881_v5 = vmul.f32 0.2, %v817_v59  ;;  %vm831_vm10 = vcmp.ge.f32.partialorder %v799_v0, 0.0  ;;  %v802_v10 = vadd.f32 %v1151_v2, %v1345_v24 }
 0x118   : > { %v863_v6 = vmul.f32 0.2, %v799_v0  ;;  %vm847_vm11 = vcmp.ge.f32.partialorder %v815_v1, 0.0  ;;  %v879_v7 = vmul.f32 0.2, %v815_v1  ;;  %v897_v8 = vsel %vm833_vm8, %v801_v58, %v865_v4  ;;  %v669_v13 = vpop.f32.mrb[15].mxu1 }
 0x119   : > { %v913_v9 = vsel %vm849_vm9, %v817_v59, %v881_v5  ;;  %v818_v11 = vadd.f32 %v1167_v3, %v1345_v24  ;;  %929 = vst [vmem:[%s1355_s19 + $0x70] sm:$0xff] %v897_v8  ;;  %v800_v16 = vadd.f32 %v1345_v24, %v605_v12  ;;  %v816_v17 = vadd.f32 %v1345_v24, %v669_v13 }
 0x11a   : > { %945 = vst [vmem:[%s1355_s19 + $0xf0] sm:$0xff] %v913_v9  ;;  %v895_v14 = vsel %vm831_vm10, %v799_v0, %v863_v6  ;;  %v911_v15 = vsel %vm847_vm11, %v815_v1, %v879_v7  ;;  %vm834_vm12 = vcmp.ge.f32.partialorder %v802_v10, 0.0  ;;  %v866_v18 = vmul.f32 0.2, %v802_v10 }
 0x11b   : > { %927 = vst [vmem:[%s1355_s19 + $0x60] sm:$0xff] %v895_v14  ;;  %943 = vst [vmem:[%s1355_s19 + $0xe0] sm:$0xff] %v911_v15  ;;  %vm850_vm13 = vcmp.ge.f32.partialorder %v818_v11, 0.0  ;;  %v882_v19 = vmul.f32 0.2, %v818_v11  ;;  %vm832_vm14 = vcmp.ge.f32.partialorder %v800_v16, 0.0 }
 0x11c   : > { %v864_v20 = vmul.f32 0.2, %v800_v16  ;;  %vm848_vm15 = vcmp.ge.f32.partialorder %v816_v17, 0.0  ;;  %v880_v21 = vmul.f32 0.2, %v816_v17  ;;  %v898_v22 = vsel %vm834_vm12, %v802_v10, %v866_v18 }
 0x11d   : > { %v914_v23 = vsel %vm850_vm13, %v818_v11, %v882_v19  ;;  %930 = vst [vmem:[%s1355_s19 + $0x78] sm:$0xff] %v898_v22 }
 0x11e   : > { %946 = vst [vmem:[%s1355_s19 + $0xf8] sm:$0xff] %v914_v23  ;;  %v896_v25 = vsel %vm832_vm14, %v800_v16, %v864_v20  ;;  %v912_v26 = vsel %vm848_vm15, %v816_v17, %v880_v21 }
 0x11f   : > { %928 = vst [vmem:[%s1355_s19 + $0x68] sm:$0xff] %v896_v25  ;;  %944 = vst [vmem:[%s1355_s19 + $0xe8] sm:$0xff] %v912_v26 }
 0x120 PF: > { %s13_s14 = sadd.s32 1, %s1254_s14   ;;  %s1430_s12 = smov %s1250_s13 }
 0x121   : > { %p10_p5 = scmp.ge.s32.totalorder %s13_s14, 4   ;;  %s1431_s13 = smov %s1433_s15 }
 0x123   :  { %12 = sbr.rel (!%p10_p5) target bundleno = 2 (0x2), region = 76 }

// kernel: spectral_discriminator.6
= control target key start
LH: loop header
LB: loop body
LE: loop exit
PB: predicated region body
PF: predicated region fallthrough
CT: control target
= control target key end

     0   :  { %s652_s1 = inlined_call_operand.vmem [shape: bf16[128,128], index: 1, kind: input, shape index: {}]   ;;  %s653_s0 = inlined_call_operand.vmem [shape: bf16[128,128], index: 0, kind: input, shape index: {}]   ;;  %s654_s2 = inlined_call_operand.vmem [shape: f32[1,128], index: 2, kind: input, shape index: {}]   ;;  %s655_s3 = inlined_call_operand.vmem [shape: f32[128,128], index: 3, kind: output, shape index: {}]  }
   0x1   :  { %v499_v0 = vld [vmem:[%s652_s1] sm:$0xff]   ;;  %v500_v1 = vld [vmem:[%s652_s1 + $0x8] sm:$0xff]   ;;  %v501_v2 = vld [vmem:[%s652_s1 + $0x10] sm:$0xff]  }
   0x2   :  { %451 = vmatprep.subr.bf16.mxu0 %v499_v0  ;;  %483 = vmatprep.subr.bf16.mxu1 %v499_v0  ;;  %v502_v3 = vld [vmem:[%s652_s1 + $0x18] sm:$0xff]   ;;  %v507_v4 = vld [vmem:[%s653_s0] sm:$0xff]   ;;  %v504_v7 = vld [vmem:[%s652_s1 + $0x28] sm:$0xff]  }
   0x3   :  { %452 = vmatpush3.bf16.msra.mxu0 %v499_v0  ;;  %491 = vmatpush3.bf16.msra.mxu1 %v499_v0  ;;  %v508_v5 = vld [vmem:[%s653_s0 + $0x20] sm:$0xff]   ;;  %v505_v8 = vld [vmem:[%s652_s1 + $0x30] sm:$0xff]   ;;  %v506_v9 = vld [vmem:[%s652_s1 + $0x38] sm:$0xff]  }
   0x4   :  { %453 = vmatprep.subr.bf16.mxu0 %v500_v1  ;;  %484 = vmatprep.subr.bf16.mxu1 %v500_v1  ;;  %v503_v6 = vld [vmem:[%s652_s1 + $0x20] sm:$0xff]   ;;  %v509_v10 = vld [vmem:[%s653_s0 + $0x8] sm:$0xff]   ;;  %v511_v12 = vld [vmem:[%s653_s0 + $0x10] sm:$0xff]  }
   0x5   :  { %467 = vmatprep.mubr.bf16.mxu0 %v507_v4  ;;  %475 = vmatprep.mubr.bf16.mxu1 %v508_v5  ;;  %v510_v11 = vld [vmem:[%s653_s0 + $0x28] sm:$0xff]   ;;  %v512_v13 = vld [vmem:[%s653_s0 + $0x30] sm:$0xff]   ;;  %v513_v14 = vld [vmem:[%s653_s0 + $0x18] sm:$0xff]  }
   0x6   :  { %v514_v15 = vld [vmem:[%s653_s0 + $0x38] sm:$0xff]   ;;  %v586_v16 = vld [vmem:[%s654_s2] ss:$0 sm:$0xff] }
   0x7   :  { %454 = vmatpush3.bf16.msra.mxu0 %v500_v1  ;;  %492 = vmatpush3.bf16.msra.mxu1 %v500_v1 }
   0x8   :  { %455 = vmatprep.subr.bf16.mxu0 %v501_v2  ;;  %485 = vmatprep.subr.bf16.mxu1 %v501_v2 }
   0xb   :  { %456 = vmatpush3.bf16.msra.mxu0 %v501_v2  ;;  %493 = vmatpush3.bf16.msra.mxu1 %v501_v2 }
   0xc   :  { %457 = vmatprep.subr.bf16.mxu0 %v502_v3  ;;  %486 = vmatprep.subr.bf16.mxu1 %v502_v3 }
   0xf   :  { %458 = vmatpush3.bf16.msra.mxu0 %v502_v3  ;;  %494 = vmatpush3.bf16.msra.mxu1 %v502_v3 }
  0x10   :  { %459 = vmatprep.subr.bf16.mxu0 %v503_v6  ;;  %487 = vmatprep.subr.bf16.mxu1 %v503_v6 }
  0x13   :  { %460 = vmatpush3.bf16.msra.mxu0 %v503_v6  ;;  %495 = vmatpush3.bf16.msra.mxu1 %v503_v6 }
  0x14   :  { %461 = vmatprep.subr.bf16.mxu0 %v504_v7  ;;  %488 = vmatprep.subr.bf16.mxu1 %v504_v7 }
  0x17   :  { %462 = vmatpush3.bf16.msra.mxu0 %v504_v7  ;;  %496 = vmatpush3.bf16.msra.mxu1 %v504_v7 }
  0x18   :  { %463 = vmatprep.subr.bf16.mxu0 %v505_v8  ;;  %489 = vmatprep.subr.bf16.mxu1 %v505_v8 }
  0x1b   :  { %464 = vmatpush3.bf16.msra.mxu0 %v505_v8  ;;  %497 = vmatpush3.bf16.msra.mxu1 %v505_v8 }
  0x1c   :  { %465 = vmatprep.subr.bf16.mxu0 %v506_v9  ;;  %490 = vmatprep.subr.bf16.mxu1 %v506_v9 }
  0x1f   :  { %466 = vmatpush3.bf16.msra.mxu0 %v506_v9  ;;  %498 = vmatpush3.bf16.msra.mxu1 %v506_v9 }
  0x22   :  { %468 = vmatmul.mubr.bf16.vlgmr.msra.gmra.mrb[0].mxu0 %v509_v10  ;;  %476 = vmatmul.mubr.bf16.vlgmr.msra.gmra.mrb[0].mxu1 %v510_v11 }
  0x23   :  { %471 = vmatprep.mubr.bf16.mxu0 %v511_v12  ;;  %479 = vmatprep.mubr.bf16.mxu1 %v512_v13 }
  0x2a   :  { %472 = vmatmul.mubr.bf16.gmra.mrb[4].mxu0 %v513_v14  ;;  %480 = vmatmul.mubr.bf16.gmra.mrb[4].mxu1 %v514_v15 }
  0xf5   :  { %v469_v17 = vpop.f32.mrb[0].mxu0  ;;  %v477_v18 = vpop.f32.mrb[0].mxu1 }
  0xf6   :  { %v336_v19 = vadd.f32 %v469_v17, %v586_v16  ;;  %v344_v20 = vadd.f32 %v477_v18, %v586_v16  ;;  %v213_v21 = vpop.f32.mrb[1].mxu0  ;;  %v245_v22 = vpop.f32.mrb[1].mxu1 }
  0xf7   :  { %v334_v23 = vadd.f32 %v586_v16, %v213_v21  ;;  %v342_v24 = vadd.f32 %v586_v16, %v245_v22  ;;  %v470_v25 = vpop.f32.mrb[2].mxu0  ;;  %v478_v26 = vpop.f32.mrb[2].mxu1 }
  0xf8   :  { %vm352_vm0 = vcmp.ge.f32.partialorder %v336_v19, 0.0  ;;  %v368_v27 = vmul.f32 0.2, %v336_v19  ;;  %vm360_vm1 = vcmp.ge.f32.partialorder %v344_v20, 0.0  ;;  %v376_v28 = vmul.f32 0.2, %v344_v20 }
  0xf9   :  { %vm350_vm2 = vcmp.ge.f32.partialorder %v334_v23, 0.0  ;;  %v366_v29 = vmul.f32 0.2, %v334_v23  ;;  %vm358_vm3 = vcmp.ge.f32.partialorder %v342_v24, 0.0  ;;  %v374_v30 = vmul.f32 0.2, %v342_v24 }
  0xfa   :  { %v384_v31 = vsel %vm352_vm0, %v336_v19, %v368_v27  ;;  %v392_v32 = vsel %vm360_vm1, %v344_v20, %v376_v28  ;;  %v337_v33 = vadd.f32 %v470_v25, %v586_v16  ;;  %v345_v34 = vadd.f32 %v478_v26, %v586_v16  ;;  %v216_v35 = vpop.f32.mrb[3].mxu0  ;;  %v248_v36 = vpop.f32.mrb[3].mxu1 }
  0xfb   :  { %400 = vst [vmem:[%s655_s3 + $0x10] sm:$0xff] %v384_v31  ;;  %408 = vst [vmem:[%s655_s3 + $0x50] sm:$0xff] %v392_v32  ;;  %v382_v37 = vsel %vm350_vm2, %v334_v23, %v366_v29  ;;  %v390_v38 = vsel %vm358_vm3, %v342_v24, %v374_v30  ;;  %v335_v39 = vadd.f32 %v586_v16, %v216_v35 }
  0xfc   :  { %v343_v40 = vadd.f32 %v586_v16, %v248_v36  ;;  %398 = vst [vmem:[%s655_s3] sm:$0xff] %v382_v37  ;;  %406 = vst [vmem:[%s655_s3 + $0x40] sm:$0xff] %v390_v38  ;;  %vm353_vm4 = vcmp.ge.f32.partialorder %v337_v33, 0.0  ;;  %v369_v41 = vmul.f32 0.2, %v337_v33  ;;  %vm361_vm5 = vcmp.ge.f32.partialorder %v345_v34, 0.0 }
  0xfd   :  { %v377_v42 = vmul.f32 0.2, %v345_v34  ;;  %vm351_vm6 = vcmp.ge.f32.partialorder %v335_v39, 0.0  ;;  %v367_v43 = vmul.f32 0.2, %v335_v39  ;;  %v473_v47 = vpop.f32.mrb[4].mxu0 }
  0xfe   :  { %vm359_vm7 = vcmp.ge.f32.partialorder %v343_v40, 0.0  ;;  %v375_v44 = vmul.f32 0.2, %v343_v40  ;;  %v385_v45 = vsel %vm353_vm4, %v337_v33, %v369_v41  ;;  %v481_v48 = vpop.f32.mrb[4].mxu1  ;;  %v340_v51 = vadd.f32 %v473_v47, %v586_v16  ;;  %v229_v53 = vpop.f32.mrb[5].mxu0 }
  0xff   :  { %v393_v46 = vsel %vm361_vm5, %v345_v34, %v377_v42  ;;  %401 = vst [vmem:[%s655_s3 + $0x18] sm:$0xff] %v385_v45  ;;  %v383_v49 = vsel %vm351_vm6, %v335_v39, %v367_v43  ;;  %v348_v52 = vadd.f32 %v481_v48, %v586_v16  ;;  %v261_v54 = vpop.f32.mrb[5].mxu1  ;;  %v338_v55 = vadd.f32 %v586_v16, %v229_v53  ;;  %v474_v57 = vpop.f32.mrb[6].mxu0 }
 0x100   :  { %409 = vst [vmem:[%s655_s3 + $0x58] sm:$0xff] %v393_v46  ;;  %v391_v50 = vsel %vm359_vm7, %v343_v40, %v375_v44  ;;  %399 = vst [vmem:[%s655_s3 + $0x8] sm:$0xff] %v383_v49  ;;  %v346_v56 = vadd.f32 %v586_v16, %v261_v54  ;;  %v482_v58 = vpop.f32.mrb[6].mxu1  ;;  %vm356_vm8 = vcmp.ge.f32.partialorder %v340_v51, 0.0  ;;  %v372_v59 = vmul.f32 0.2, %v340_v51 }
 0x101   :  { %407 = vst [vmem:[%s655_s3 + $0x48] sm:$0xff] %v391_v50  ;;  %vm364_vm9 = vcmp.ge.f32.partialorder %v348_v52, 0.0  ;;  %v380_v60 = vmul.f32 0.2, %v348_v52  ;;  %vm354_vm10 = vcmp.ge.f32.partialorder %v338_v55, 0.0  ;;  %v341_v1 = vadd.f32 %v474_v57, %v586_v16  ;;  %v232_v3 = vpop.f32.mrb[7].mxu0 }
 0x102   :  { %v370_v61 = vmul.f32 0.2, %v338_v55  ;;  %vm362_vm11 = vcmp.ge.f32.partialorder %v346_v56, 0.0  ;;  %v378_v62 = vmul.f32 0.2, %v346_v56  ;;  %v388_v63 = vsel %vm356_vm8, %v340_v51, %v372_v59  ;;  %v264_v4 = vpop.f32.mrb[7].mxu1 }
 0x103   :  { %v396_v0 = vsel %vm364_vm9, %v348_v52, %v380_v60  ;;  %v349_v2 = vadd.f32 %v482_v58, %v586_v16  ;;  %404 = vst [vmem:[%s655_s3 + $0x30] sm:$0xff] %v388_v63  ;;  %v339_v7 = vadd.f32 %v586_v16, %v232_v3  ;;  %v347_v8 = vadd.f32 %v586_v16, %v264_v4 }
 0x104   :  { %412 = vst [vmem:[%s655_s3 + $0x70] sm:$0xff] %v396_v0  ;;  %v386_v5 = vsel %vm354_vm10, %v338_v55, %v370_v61  ;;  %v394_v6 = vsel %vm362_vm11, %v346_v56, %v378_v62  ;;  %vm357_vm12 = vcmp.ge.f32.partialorder %v341_v1, 0.0  ;;  %v373_v9 = vmul.f32 0.2, %v341_v1 }
 0x105   :  { %402 = vst [vmem:[%s655_s3 + $0x20] sm:$0xff] %v386_v5  ;;  %410 = vst [vmem:[%s655_s3 + $0x60] sm:$0xff] %v394_v6  ;;  %vm365_vm13 = vcmp.ge.f32.partialorder %v349_v2, 0.0  ;;  %v381_v10 = vmul.f32 0.2, %v349_v2  ;;  %vm355_vm14 = vcmp.ge.f32.partialorder %v339_v7, 0.0 }
 0x106   :  { %v371_v11 = vmul.f32 0.2, %v339_v7  ;;  %vm363_vm15 = vcmp.ge.f32.partialorder %v347_v8, 0.0  ;;  %v379_v12 = vmul.f32 0.2, %v347_v8  ;;  %v389_v13 = vsel %vm357_vm12, %v341_v1, %v373_v9 }
 0x107   :  { %v397_v14 = vsel %vm365_vm13, %v349_v2, %v381_v10  ;;  %405 = vst [vmem:[%s655_s3 + $0x38] sm:$0xff] %v389_v13 }
 0x108   :  { %413 = vst [vmem:[%s655_s3 + $0x78] sm:$0xff] %v397_v14  ;;  %v387_v15 = vsel %vm355_vm14, %v339_v7, %v371_v11  ;;  %v395_v16 = vsel %vm363_vm15, %v347_v8, %v379_v12 }
 0x109   :  { %403 = vst [vmem:[%s655_s3 + $0x28] sm:$0xff] %v387_v15  ;;  %411 = vst [vmem:[%s655_s3 + $0x68] sm:$0xff] %v395_v16 }

// kernel: spectral_discriminator.7
= control target key start
LH: loop header
LB: loop body
LE: loop exit
PB: predicated region body
PF: predicated region fallthrough
CT: control target
= control target key end

     0   :  { %s456_s1 = inlined_call_operand.vmem [shape: bf16[256,128], index: 1, kind: input, shape index: {}]   ;;  %s457_s0 = inlined_call_operand.vmem [shape: bf16[32,256], index: 0, kind: input, shape index: {}]   ;;  %s458_s2 = inlined_call_operand.vmem [shape: f32[1,128], index: 2, kind: input, shape index: {}]   ;;  %s459_s3 = inlined_call_operand.vmem [shape: f32[32,128], index: 3, kind: output, shape index: {}]  }
   0x1   :  { %v339_v0 = vld [vmem:[%s456_s1 + $0x40] sm:$0xff]   ;;  %v341_v2 = vld [vmem:[%s456_s1 + $0x48] sm:$0xff]   ;;  %v343_v4 = vld [vmem:[%s456_s1 + $0x50] sm:$0xff]  }
   0x2   :  { %v340_v1 = vld [vmem:[%s456_s1] sm:$0xff]   ;;  %295 = vmatprep.subr.bf16.mxu0 %v339_v0  ;;  %323 = vmatprep.subr.bf16.mxu1 %v339_v0  ;;  %v342_v3 = vld [vmem:[%s456_s1 + $0x8] sm:$0xff]   ;;  %v344_v5 = vld [vmem:[%s456_s1 + $0x10] sm:$0xff]  }
   0x3   :  { %296 = vmatpush3.bf16.msra.mxu0 %v340_v1  ;;  %331 = vmatpush3.bf16.msra.mxu1 %v340_v1  ;;  %v345_v6 = vld [vmem:[%s456_s1 + $0x58] sm:$0xff]   ;;  %v347_v8 = vld [vmem:[%s456_s1 + $0x60] sm:$0xff]   ;;  %v349_v10 = vld [vmem:[%s456_s1 + $0x68] sm:$0xff]  }
   0x4   :  { %297 = vmatprep.subr.bf16.mxu0 %v341_v2  ;;  %324 = vmatprep.subr.bf16.mxu1 %v341_v2  ;;  %v346_v7 = vld [vmem:[%s456_s1 + $0x18] sm:$0xff]   ;;  %v348_v9 = vld [vmem:[%s456_s1 + $0x20] sm:$0xff]   ;;  %v350_v13 = vld [vmem:[%s456_s1 + $0x28] sm:$0xff]  }
   0x5   :  { %v357_v11 = vld [vmem:[%s457_s0 + $0x4] ss:$8 sps:$4 sm:$0xff]   ;;  %v360_v12 = vld [vmem:[%s457_s0 + $0x14] ss:$8 sps:$4 sm:$0xff]   ;;  %v355_v18 = vld [vmem:[%s457_s0] ss:$8 sps:$4 sm:$0xff]  }
   0x6   :  { %v351_v14 = vld [vmem:[%s456_s1 + $0x70] sm:$0xff]   ;;  %211 = vmatprep.mubr.bf16.mxu0 %v357_v11  ;;  %219 = vmatprep.mubr.bf16.mxu1 %v360_v12  ;;  %v353_v16 = vld [vmem:[%s456_s1 + $0x78] sm:$0xff]   ;;  %v294_v23 = vld [vmem:[%s458_s2] ss:$0 sm:$0xff] }
   0x7   :  { %298 = vmatpush3.bf16.msra.mxu0 %v342_v3  ;;  %332 = vmatpush3.bf16.msra.mxu1 %v342_v3  ;;  %v352_v15 = vld [vmem:[%s456_s1 + $0x30] sm:$0xff]   ;;  %v354_v17 = vld [vmem:[%s456_s1 + $0x38] sm:$0xff]  }
   0x8   :  { %299 = vmatprep.subr.bf16.mxu0 %v343_v4  ;;  %325 = vmatprep.subr.bf16.mxu1 %v343_v4  ;;  %v358_v19 = vld [vmem:[%s457_s0 + $0x10] ss:$8 sps:$4 sm:$0xff]  }
   0xb   :  { %300 = vmatpush3.bf16.msra.mxu0 %v344_v5  ;;  %333 = vmatpush3.bf16.msra.mxu1 %v344_v5 }
   0xc   :  { %301 = vmatprep.subr.bf16.mxu0 %v345_v6  ;;  %326 = vmatprep.subr.bf16.mxu1 %v345_v6 }
   0xf   :  { %302 = vmatpush3.bf16.msra.mxu0 %v346_v7  ;;  %334 = vmatpush3.bf16.msra.mxu1 %v346_v7 }
  0x10   :  { %303 = vmatprep.subr.bf16.mxu0 %v347_v8  ;;  %327 = vmatprep.subr.bf16.mxu1 %v347_v8 }
  0x13   :  { %304 = vmatpush3.bf16.msra.mxu0 %v348_v9  ;;  %335 = vmatpush3.bf16.msra.mxu1 %v348_v9 }
  0x14   :  { %305 = vmatprep.subr.bf16.mxu0 %v349_v10  ;;  %328 = vmatprep.subr.bf16.mxu1 %v349_v10 }
  0x17   :  { %306 = vmatpush3.bf16.msra.mxu0 %v350_v13  ;;  %336 = vmatpush3.bf16.msra.mxu1 %v350_v13 }
  0x18   :  { %307 = vmatprep.subr.bf16.mxu0 %v351_v14  ;;  %329 = vmatprep.subr.bf16.mxu1 %v351_v14 }
  0x1b   :  { %308 = vmatpush3.bf16.msra.mxu0 %v352_v15  ;;  %337 = vmatpush3.bf16.msra.mxu1 %v352_v15 }
  0x1c   :  { %309 = vmatprep.subr.bf16.mxu0 %v353_v16  ;;  %330 = vmatprep.subr.bf16.mxu1 %v353_v16 }
  0x1f   :  { %310 = vmatpush3.bf16.msra.mxu0 %v354_v17  ;;  %338 = vmatpush3.bf16.msra.mxu1 %v354_v17 }
  0x22   :  { %212 = vmatmul.mubr.bf16.vlgmr.msra.gmra.mrb[0].mxu0 %v355_v18  ;;  %220 = vmatmul.mubr.bf16.vlgmr.msra.gmra.mrb[0].mxu1 %v358_v19 }
  0xf5   :  { %v311_v20 = vpop.f32.mrb[0].mxu0  ;;  %v317_v21 = vpop.f32.mrb[0].mxu1 }
  0xf6   :  { %v312_v22 = vpop.f32.mrb[1].mxu0  ;;  %v318_v24 = vpop.f32.mrb[1].mxu1 }
  0xf7   :  { %v313_v25 = vadd.f32 %v312_v22, %v311_v20  ;;  %v319_v26 = vadd.f32 %v318_v24, %v317_v21  ;;  %v314_v27 = vpop.f32.mrb[2].mxu0  ;;  %v320_v28 = vpop.f32.mrb[2].mxu1 }
  0xf8   :  { %v315_v29 = vpop.f32.mrb[3].mxu0  ;;  %v321_v30 = vpop.f32.mrb[3].mxu1 }
  0xf9   :  { %v250_v31 = vadd.f32 %v313_v25, %v294_v23  ;;  %v252_v32 = vadd.f32 %v319_v26, %v294_v23  ;;  %v316_v33 = vadd.f32 %v315_v29, %v314_v27  ;;  %v322_v34 = vadd.f32 %v321_v30, %v320_v28 }
  0xfb   :  { %vm254_vm0 = vcmp.ge.f32.partialorder %v250_v31, 0.0  ;;  %v258_v35 = vmul.f32 0.2, %v250_v31  ;;  %vm256_vm1 = vcmp.ge.f32.partialorder %v252_v32, 0.0  ;;  %v260_v36 = vmul.f32 0.2, %v252_v32 }
  0xfc   :  { %v251_v37 = vadd.f32 %v316_v33, %v294_v23  ;;  %v253_v38 = vadd.f32 %v322_v34, %v294_v23 }
  0xfd   :  { %v262_v39 = vsel %vm254_vm0, %v250_v31, %v258_v35  ;;  %v264_v40 = vsel %vm256_vm1, %v252_v32, %v260_v36 }
  0xfe   :  { %266 = vst [vmem:[%s459_s3] sm:$0xff] %v262_v39  ;;  %268 = vst [vmem:[%s459_s3 + $0x10] sm:$0xff] %v264_v40  ;;  %vm255_vm2 = vcmp.ge.f32.partialorder %v251_v37, 0.0  ;;  %v259_v41 = vmul.f32 0.2, %v251_v37  ;;  %vm257_vm3 = vcmp.ge.f32.partialorder %v253_v38, 0.0 }
  0xff   :  { %v261_v42 = vmul.f32 0.2, %v253_v38 }
 0x100   :  { %v263_v43 = vsel %vm255_vm2, %v251_v37, %v259_v41 }
 0x101   :  { %v265_v44 = vsel %vm257_vm3, %v253_v38, %v261_v42  ;;  %267 = vst [vmem:[%s459_s3 + $0x8] sm:$0xff] %v263_v43 }
 0x102   :  { %269 = vst [vmem:[%s459_s3 + $0x18] sm:$0xff] %v265_v44 }

// kernel: spectral_discriminator.8
= control target key start
LH: loop header
LB: loop body
LE: loop exit
PB: predicated region body
PF: predicated region fallthrough
CT: control target
= control target key end

     0   :  { %s671_s1 = inlined_call_operand.vmem [shape: bf16[512,128], index: 1, kind: input, shape index: {}]   ;;  %s672_s0 = inlined_call_operand.vmem [shape: bf16[16,512], index: 0, kind: input, shape index: {}]   ;;  %s673_s2 = inlined_call_operand.vmem [shape: f32[1,128], index: 2, kind: input, shape index: {}]   ;;  %s674_s3 = inlined_call_operand.vmem [shape: f32[16,128], index: 3, kind: output, shape index: {}]  }
   0x1   :  { %v496_v0 = vld [vmem:[%s671_s1 + $0x40] sm:$0xff]   ;;  %v500_v4 = vld [vmem:[%s671_s1 + $0x48] sm:$0xff]   ;;  %v504_v8 = vld [vmem:[%s671_s1 + $0x50] sm:$0xff]  }
   0x2   :  { %v497_v1 = vld [vmem:[%s671_s1 + $0xc0] sm:$0xff]   ;;  %452 = vmatprep.subr.bf16.mxu0 %v496_v0  ;;  %v501_v5 = vld [vmem:[%s671_s1 + $0xc8] sm:$0xff]   ;;  %v505_v9 = vld [vmem:[%s671_s1 + $0xd0] sm:$0xff]  }
   0x3   :  { %v498_v2 = vld [vmem:[%s671_s1] sm:$0xff]   ;;  %474 = vmatprep.subr.bf16.mxu1 %v497_v1  ;;  %v502_v6 = vld [vmem:[%s671_s1 + $0x8] sm:$0xff]   ;;  %v506_v10 = vld [vmem:[%s671_s1 + $0x10] sm:$0xff]  }
   0x4   :  { %v499_v3 = vld [vmem:[%s671_s1 + $0x80] sm:$0xff]   ;;  %453 = vmatpush3.bf16.msra.mxu0 %v498_v2  ;;  %v503_v7 = vld [vmem:[%s671_s1 + $0x88] sm:$0xff]   ;;  %v507_v11 = vld [vmem:[%s671_s1 + $0x90] sm:$0xff]  }
   0x5   :  { %475 = vmatpush3.bf16.msra.mxu1 %v499_v3  ;;  %454 = vmatprep.subr.bf16.mxu0 %v500_v4  ;;  %v508_v12 = vld [vmem:[%s671_s1 + $0x58] sm:$0xff]   ;;  %v512_v16 = vld [vmem:[%s671_s1 + $0x60] sm:$0xff]   ;;  %v516_v20 = vld [vmem:[%s671_s1 + $0x68] sm:$0xff]  }
   0x6   :  { %476 = vmatprep.subr.bf16.mxu1 %v501_v5  ;;  %v509_v13 = vld [vmem:[%s671_s1 + $0xd8] sm:$0xff]   ;;  %v513_v17 = vld [vmem:[%s671_s1 + $0xe0] sm:$0xff]   ;;  %v517_v21 = vld [vmem:[%s671_s1 + $0xe8] sm:$0xff]  }
   0x7   :  { %v510_v14 = vld [vmem:[%s671_s1 + $0x18] sm:$0xff]   ;;  %v514_v18 = vld [vmem:[%s671_s1 + $0x20] sm:$0xff]   ;;  %v518_v22 = vld [vmem:[%s671_s1 + $0x28] sm:$0xff]  }
   0x8   :  { %455 = vmatpush3.bf16.msra.mxu0 %v502_v6  ;;  %v511_v15 = vld [vmem:[%s671_s1 + $0x98] sm:$0xff]   ;;  %v515_v19 = vld [vmem:[%s671_s1 + $0xa0] sm:$0xff]   ;;  %v519_v23 = vld [vmem:[%s671_s1 + $0xa8] sm:$0xff]  }
   0x9   :  { %477 = vmatpush3.bf16.msra.mxu1 %v503_v7  ;;  %456 = vmatprep.subr.bf16.mxu0 %v504_v8  ;;  %v520_v24 = vld [vmem:[%s671_s1 + $0x70] sm:$0xff]   ;;  %v524_v28 = vld [vmem:[%s671_s1 + $0x78] sm:$0xff]   ;;  %v451_v45 = vld [vmem:[%s673_s2] ss:$0 sm:$0xff] }
   0xa   :  { %478 = vmatprep.subr.bf16.mxu1 %v505_v9  ;;  %v521_v25 = vld [vmem:[%s671_s1 + $0xf0] sm:$0xff]   ;;  %v525_v29 = vld [vmem:[%s671_s1 + $0xf8] sm:$0xff]  }
   0xb   :  { %v522_v26 = vld [vmem:[%s671_s1 + $0x30] sm:$0xff]   ;;  %v526_v30 = vld [vmem:[%s671_s1 + $0x38] sm:$0xff]  }
   0xc   :  { %457 = vmatpush3.bf16.msra.mxu0 %v506_v10  ;;  %v523_v27 = vld [vmem:[%s671_s1 + $0xb0] sm:$0xff]   ;;  %v527_v31 = vld [vmem:[%s671_s1 + $0xb8] sm:$0xff]  }
   0xd   :  { %479 = vmatpush3.bf16.msra.mxu1 %v507_v11  ;;  %458 = vmatprep.subr.bf16.mxu0 %v508_v12  ;;  %v528_v32 = vld [vmem:[%s672_s0] ss:$16 sps:$4 sm:$0xff]   ;;  %v530_v33 = vld [vmem:[%s672_s0 + $0x4] ss:$16 sps:$4 sm:$0xff]   ;;  %v531_v34 = vld [vmem:[%s672_s0 + $0x8] ss:$16 sps:$4 sm:$0xff]  }
   0xe   :  { %480 = vmatprep.subr.bf16.mxu1 %v509_v13  ;;  %v533_v35 = vld [vmem:[%s672_s0 + $0xc] ss:$16 sps:$4 sm:$0xff]   ;;  %335 = vmatprep.mubr.bf16.mxu0 %v530_v33 }
   0xf   :  { %376 = vmatprep.mubr.bf16.mxu1 %v533_v35 }
  0x10   :  { %459 = vmatpush3.bf16.msra.mxu0 %v510_v14 }
  0x11   :  { %481 = vmatpush3.bf16.msra.mxu1 %v511_v15  ;;  %460 = vmatprep.subr.bf16.mxu0 %v512_v16 }
  0x12   :  { %482 = vmatprep.subr.bf16.mxu1 %v513_v17 }
  0x14   :  { %461 = vmatpush3.bf16.msra.mxu0 %v514_v18 }
  0x15   :  { %483 = vmatpush3.bf16.msra.mxu1 %v515_v19  ;;  %462 = vmatprep.subr.bf16.mxu0 %v516_v20 }
  0x16   :  { %484 = vmatprep.subr.bf16.mxu1 %v517_v21 }
  0x18   :  { %463 = vmatpush3.bf16.msra.mxu0 %v518_v22 }
  0x19   :  { %485 = vmatpush3.bf16.msra.mxu1 %v519_v23  ;;  %464 = vmatprep.subr.bf16.mxu0 %v520_v24 }
  0x1a   :  { %486 = vmatprep.subr.bf16.mxu1 %v521_v25 }
  0x1c   :  { %465 = vmatpush3.bf16.msra.mxu0 %v522_v26 }
  0x1d   :  { %487 = vmatpush3.bf16.msra.mxu1 %v523_v27  ;;  %466 = vmatprep.subr.bf16.mxu0 %v524_v28 }
  0x1e   :  { %488 = vmatprep.subr.bf16.mxu1 %v525_v29 }
  0x20   :  { %467 = vmatpush3.bf16.msra.mxu0 %v526_v30 }
  0x21   :  { %489 = vmatpush3.bf16.msra.mxu1 %v527_v31 }
  0x23   :  { %336 = vmatmul.mubr.bf16.vlgmr.msra.gmra.mrb[0].mxu0 %v528_v32 }
  0x24   :  { %377 = vmatmul.mubr.bf16.vlgmr.msra.gmra.mrb[0].mxu1 %v531_v34 }
  0xf6   :  { %v468_v36 = vpop.f32.mrb[0].mxu0 }
  0xf7   :  { %v490_v37 = vpop.f32.mrb[0].mxu1  ;;  %v469_v38 = vpop.f32.mrb[1].mxu0 }
  0xf8   :  { %v470_v39 = vadd.f32 %v469_v38, %v468_v36  ;;  %v491_v40 = vpop.f32.mrb[1].mxu1  ;;  %v471_v41 = vpop.f32.mrb[2].mxu0 }
  0xf9   :  { %v492_v42 = vadd.f32 %v491_v40, %v490_v37  ;;  %v493_v43 = vpop.f32.mrb[2].mxu1  ;;  %v472_v44 = vpop.f32.mrb[3].mxu0 }
  0xfa   :  { %v473_v46 = vadd.f32 %v472_v44, %v471_v41  ;;  %v494_v47 = vpop.f32.mrb[3].mxu1 }
  0xfb   :  { %v379_v48 = vadd.f32 %v492_v42, %v470_v39  ;;  %v495_v49 = vadd.f32 %v494_v47, %v493_v43 }
  0xfd   :  { %v401_v50 = vadd.f32 %v451_v45, %v379_v48  ;;  %v382_v51 = vadd.f32 %v495_v49, %v473_v46 }
  0xff   :  { %vm403_vm0 = vcmp.ge.f32.partialorder %v401_v50, 0.0  ;;  %v405_v52 = vmul.f32 0.2, %v401_v50  ;;  %v402_v53 = vadd.f32 %v451_v45, %v382_v51 }
 0x101   :  { %v407_v54 = vsel %vm403_vm0, %v401_v50, %v405_v52  ;;  %vm404_vm1 = vcmp.ge.f32.partialorder %v402_v53, 0.0  ;;  %v406_v55 = vmul.f32 0.2, %v402_v53 }
 0x102   :  { %409 = vst [vmem:[%s674_s3] sm:$0xff] %v407_v54 }
 0x103   :  { %v408_v56 = vsel %vm404_vm1, %v402_v53, %v406_v55 }
 0x104   :  { %410 = vst [vmem:[%s674_s3 + $0x8] sm:$0xff] %v408_v56 }

// kernel: spectral_discriminator.9
= control target key start
LH: loop header
LB: loop body
LE: loop exit
PB: predicated region body
PF: predicated region fallthrough
CT: control target
= control target key end

     0   :  { %s1021_s12 = smov 0   ;;  %s1023_s13 = smov 0   ;;  %s1137_s0 = inlined_call_operand.vmem [shape: bf16[16,1024], index: 0, kind: input, shape index: {}]   ;;  %s1138_s1 = inlined_call_operand.vmem [shape: bf16[1024,128], index: 1, kind: input, shape index: {}]   ;;  %s1139_s2 = inlined_call_operand.vmem [shape: f32[1,128], index: 2, kind: input, shape index: {}]   ;;  %s1140_s3 = inlined_call_operand.vmem [shape: f32[16,128], index: 3, kind: output, shape index: {}]  }
   0x1   :  { %s1025_s14 = smov 0   ;;  %s1027_s15 = smov 0  }
   0x2   :  { %s1029_s16 = smov 0  }
   0x3 LB: > { %s25_s17 = sadd.s32 1, %s994_s15  ;;  %p48_p1 = scmp.ne.s32.totalorder %s986_s13, %s982_s12  ;;  %s998_s16 = sphi %s1029_s16, %s13_s16   ;;  %s994_s15 = sphi %s1027_s15, %s1144_s15   ;;  %s990_s14 = sphi %s1025_s14, %s1143_s14   ;;  %s986_s13 = sphi %s1023_s13, %s1142_s13   ;;  %s982_s12 = sphi %s1021_s12, %s1141_s12  }
   0x4   : > { %p26_p0 = scmp.ge.s32.totalorder %s25_s17, 2  ;;  %p49_p2 = scmp.eq.s32.totalorder %s998_s16, 0 }
   0x5   : > { %s41_s19 = sadd.s32 1, %s986_s13  ;;  %p785_p5 = scmp.ge.s32.totalorder %s998_s16, 2 }
   0x6   : > { %s1146_s17 = smov (%p26_p0, %s25_s17), 0  ;;  %p50_p3 = por %p49_p2, %p48_p1 }
   0x7   : > { %s37_s18 = ssub.s32 %s994_s15, %s1146_s17  ;;  %162 = sbr.rel (%p785_p5) target bundleno = 21 (0x15), region = 20 }
   0x8   : > { %p39_p4 = scmp.eq.s32.totalorder %s37_s18, 0 }
   0xa   : > { %s1056_s20 = scalar_select %p39_p4, %s986_s13, %s41_s19  }
   0xe   : > { %165 = sbr.rel (!%p50_p3) target bundleno = 21 (0x15), region = 24  ;;  %s167_s21 = sand.u32 (%p50_p3), 1, %s986_s13  }
   0xf   : > { %s836_s22 = sshll.u32 (%p50_p3), %s994_s15, 4  ;;  %s786_s23 = sshll.u32 (%p50_p3), %s167_s21, 5 }
  0x10   : > { %s175_s26 = scalar_lea.vmem (%p50_p3), %s1137_s0, %s836_s22  ;;  %s169_s27 = scalar_lea.vmem (%p50_p3), [#allocation3], %s786_s23 }
  0x11   : > { %v188_v0 = vld [vmem:[%s175_s26] sm:$0xff] (%p50_p3)  ;;  %v190_v1 = vld [vmem:[%s175_s26 + $0x8] sm:$0xff] (%p50_p3) }
  0x12   : > { %v192_v2 = vld [vmem:[%s175_s26 + $0x20] sm:$0xff] (%p50_p3)  ;;  %189 = vst [vmem:[%s169_s27] sm:$0xff] (%p50_p3), %v188_v0  ;;  %191 = vst [vmem:[%s169_s27 + $0x8] sm:$0xff] (%p50_p3), %v190_v1  ;;  %v194_v3 = vld [vmem:[%s175_s26 + $0x28] sm:$0xff] (%p50_p3) }
  0x13   : > { %193 = vst [vmem:[%s169_s27 + $0x10] sm:$0xff] (%p50_p3), %v192_v2  ;;  %195 = vst [vmem:[%s169_s27 + $0x18] sm:$0xff] (%p50_p3), %v194_v3 }
  0x15 PF: > { %p789_p6 = scmp.ge.s32.totalorder %s998_s16, 1  ;;  %p212_p7 = scmp.lt.s32.totalorder %s998_s16, 3 }
  0x17   : > { %p213_p8 = pnand %p789_p6, %p212_p7 }
  0x18   : > { %s219_s28 = sand.u32 (!%p213_p8), 1, %s982_s12   ;;  %s791_s29 = sshll.u32 (!%p213_p8), %s990_s14, 6 }
  0x19   : > { %216 = sbr.rel (%p213_p8) target bundleno = 306 (0x132), region = 51  ;;  %s790_s30 = sshll.u32 (!%p213_p8), %s219_s28, 5 }
  0x1a   : > { %p259_p9 = scmp.lt.s32.totalorder (!%p213_p8), %s791_s29, 127  ;;  %s1073_s8 = scalar_lea.vmem (!%p213_p8), [#allocation3], %s790_s30 }
  0x1b   : > { %p793_p10 = scmp.ne.s32.totalorder (!%p213_p8), %s990_s14, 0 }
  0x20   : > { %s1148_s29 = smov (!%p259_p9, %s791_s29), 127  ;;  %283 = sbr.rel (%p793_p10) target bundleno = 39 (0x27), region = 59 }
  0x21   : > { %s792_s4 = sshll.u32 %s1148_s29, 2  ;;  %v1000_v4 = vmov (!%p793_p10), 0.0  }
  0x22   : > { %s1071_s7 = scalar_lea.vmem %s1138_s1, %s792_s4  ;;  %284 = vst [vmem:[#allocation2] sm:$0xff] (!%p793_p10), %v1000_v4  ;;  %285 = vst [vmem:[#allocation2 + $0x8] sm:$0xff] (!%p793_p10), %v1000_v4 }
  0x27 PF: > { %v922_v5 = vld [vmem:[%s1071_s7 + $0x40] sm:$0xff]   ;;  %v926_v9 = vld [vmem:[%s1071_s7 + $0x48] sm:$0xff]   ;;  %v930_v13 = vld [vmem:[%s1071_s7 + $0x50] sm:$0xff]   ;;  %p830_p11 = scmp.ne.s32.totalorder %s990_s14, 1 }
  0x28   : > { %v923_v6 = vld [vmem:[%s1071_s7 + $0xc0] sm:$0xff]   ;;  %837 = vmatprep.subr.bf16.mxu0 %v922_v5  ;;  %v927_v10 = vld [vmem:[%s1071_s7 + $0xc8] sm:$0xff]   ;;  %v931_v14 = vld [vmem:[%s1071_s7 + $0xd0] sm:$0xff]  }
  0x29   : > { %v924_v7 = vld [vmem:[%s1071_s7] sm:$0xff]   ;;  %859 = vmatprep.subr.bf16.mxu1 %v923_v6  ;;  %v928_v11 = vld [vmem:[%s1071_s7 + $0x8] sm:$0xff]   ;;  %v932_v15 = vld [vmem:[%s1071_s7 + $0x10] sm:$0xff]  }
  0x2a   : > { %v925_v8 = vld [vmem:[%s1071_s7 + $0x80] sm:$0xff]   ;;  %838 = vmatpush3.bf16.msra.mxu0 %v924_v7  ;;  %v929_v12 = vld [vmem:[%s1071_s7 + $0x88] sm:$0xff]   ;;  %v933_v16 = vld [vmem:[%s1071_s7 + $0x90] sm:$0xff]  }
  0x2b   : > { %860 = vmatpush3.bf16.msra.mxu1 %v925_v8  ;;  %839 = vmatprep.subr.bf16.mxu0 %v926_v9  ;;  %v934_v17 = vld [vmem:[%s1071_s7 + $0x58] sm:$0xff]   ;;  %v938_v21 = vld [vmem:[%s1071_s7 + $0x60] sm:$0xff]   ;;  %v942_v25 = vld [vmem:[%s1071_s7 + $0x68] sm:$0xff]  }
  0x2c   : > { %861 = vmatprep.subr.bf16.mxu1 %v927_v10  ;;  %v935_v18 = vld [vmem:[%s1071_s7 + $0xd8] sm:$0xff]   ;;  %v939_v22 = vld [vmem:[%s1071_s7 + $0xe0] sm:$0xff]   ;;  %v943_v26 = vld [vmem:[%s1071_s7 + $0xe8] sm:$0xff]  }
  0x2d   : > { %v936_v19 = vld [vmem:[%s1071_s7 + $0x18] sm:$0xff]   ;;  %v940_v23 = vld [vmem:[%s1071_s7 + $0x20] sm:$0xff]   ;;  %v944_v27 = vld [vmem:[%s1071_s7 + $0x28] sm:$0xff]  }
  0x2e   : > { %840 = vmatpush3.bf16.msra.mxu0 %v928_v11  ;;  %v937_v20 = vld [vmem:[%s1071_s7 + $0x98] sm:$0xff]   ;;  %v941_v24 = vld [vmem:[%s1071_s7 + $0xa0] sm:$0xff]   ;;  %v945_v28 = vld [vmem:[%s1071_s7 + $0xa8] sm:$0xff]  }
  0x2f   : > { %862 = vmatpush3.bf16.msra.mxu1 %v929_v12  ;;  %841 = vmatprep.subr.bf16.mxu0 %v930_v13  ;;  %v946_v29 = vld [vmem:[%s1071_s7 + $0x70] sm:$0xff]   ;;  %v950_v33 = vld [vmem:[%s1071_s7 + $0x78] sm:$0xff]   ;;  %v286_v50 = vld [vmem:[#allocation2] sm:$0xff] }
  0x30   : > { %863 = vmatprep.subr.bf16.mxu1 %v931_v14  ;;  %v947_v30 = vld [vmem:[%s1071_s7 + $0xf0] sm:$0xff]   ;;  %v951_v34 = vld [vmem:[%s1071_s7 + $0xf8] sm:$0xff]   ;;  %v287_v55 = vld [vmem:[#allocation2 + $0x8] sm:$0xff] }
  0x31   : > { %v948_v31 = vld [vmem:[%s1071_s7 + $0x30] sm:$0xff]   ;;  %v952_v35 = vld [vmem:[%s1071_s7 + $0x38] sm:$0xff]   ;;  %v831_v60 = vld [vmem:[%s1139_s2] ss:$0 sm:$0xff] (!%p830_p11) }
  0x32   : > { %842 = vmatpush3.bf16.msra.mxu0 %v932_v15  ;;  %v949_v32 = vld [vmem:[%s1071_s7 + $0xb0] sm:$0xff]   ;;  %v953_v36 = vld [vmem:[%s1071_s7 + $0xb8] sm:$0xff]  }
  0x33   : > { %864 = vmatpush3.bf16.msra.mxu1 %v933_v16  ;;  %843 = vmatprep.subr.bf16.mxu0 %v934_v17  ;;  %v954_v37 = vld [vmem:[%s1073_s8] ss:$16 sps:$4 sm:$0xff]   ;;  %v956_v38 = vld [vmem:[%s1073_s8 + $0x4] ss:$16 sps:$4 sm:$0xff]   ;;  %v957_v39 = vld [vmem:[%s1073_s8 + $0x8] ss:$16 sps:$4 sm:$0xff]  }
  0x34   : > { %865 = vmatprep.subr.bf16.mxu1 %v935_v18  ;;  %v959_v40 = vld [vmem:[%s1073_s8 + $0xc] ss:$16 sps:$4 sm:$0xff]   ;;  %600 = vmatprep.mubr.bf16.mxu0 %v956_v38 }
  0x35   : > { %641 = vmatprep.mubr.bf16.mxu1 %v959_v40 }
  0x36   : > { %844 = vmatpush3.bf16.msra.mxu0 %v936_v19 }
  0x37   : > { %866 = vmatpush3.bf16.msra.mxu1 %v937_v20  ;;  %845 = vmatprep.subr.bf16.mxu0 %v938_v21 }
  0x38   : > { %867 = vmatprep.subr.bf16.mxu1 %v939_v22 }
  0x3a   : > { %846 = vmatpush3.bf16.msra.mxu0 %v940_v23 }
  0x3b   : > { %868 = vmatpush3.bf16.msra.mxu1 %v941_v24  ;;  %847 = vmatprep.subr.bf16.mxu0 %v942_v25 }
  0x3c   : > { %869 = vmatprep.subr.bf16.mxu1 %v943_v26 }
  0x3e   : > { %848 = vmatpush3.bf16.msra.mxu0 %v944_v27 }
  0x3f   : > { %870 = vmatpush3.bf16.msra.mxu1 %v945_v28  ;;  %849 = vmatprep.subr.bf16.mxu0 %v946_v29 }
  0x40   : > { %871 = vmatprep.subr.bf16.mxu1 %v947_v30 }
  0x42   : > { %850 = vmatpush3.bf16.msra.mxu0 %v948_v31 }
  0x43   : > { %872 = vmatpush3.bf16.msra.mxu1 %v949_v32  ;;  %851 = vmatprep.subr.bf16.mxu0 %v950_v33 }
  0x44   : > { %873 = vmatprep.subr.bf16.mxu1 %v951_v34 }
  0x46   : > { %852 = vmatpush3.bf16.msra.mxu0 %v952_v35 }
  0x47   : > { %874 = vmatpush3.bf16.msra.mxu1 %v953_v36 }
  0x49   : > { %601 = vmatmul.mubr.bf16.vlgmr.msra.gmra.mrb[0].mxu0 %v954_v37 }
  0x4a   : > { %642 = vmatmul.mubr.bf16.vlgmr.msra.gmra.mrb[0].mxu1 %v957_v39 }
 0x11c   : > { %v853_v41 = vpop.f32.mrb[0].mxu0 }
 0x11d   : > { %v875_v42 = vpop.f32.mrb[0].mxu1  ;;  %v854_v43 = vpop.f32.mrb[1].mxu0 }
 0x11e   : > { %v855_v44 = vadd.f32 %v854_v43, %v853_v41  ;;  %v876_v45 = vpop.f32.mrb[1].mxu1  ;;  %v856_v46 = vpop.f32.mrb[2].mxu0 }
 0x11f   : > { %v877_v47 = vadd.f32 %v876_v45, %v875_v42  ;;  %v878_v48 = vpop.f32.mrb[2].mxu1  ;;  %v857_v49 = vpop.f32.mrb[3].mxu0 }
 0x120   : > { %v858_v51 = vadd.f32 %v857_v49, %v856_v46  ;;  %v879_v52 = vpop.f32.mrb[3].mxu1 }
 0x121   : > { %v644_v53 = vadd.f32 %v877_v47, %v855_v44  ;;  %v880_v54 = vadd.f32 %v879_v52, %v878_v48  ;;  %657 = sbr.rel (%p830_p11) target bundleno = 306 (0x132), region = 63 }
 0x123   : > { %v650_v56 = vadd.f32 %v644_v53, %v286_v50  ;;  %v647_v57 = vadd.f32 %v880_v54, %v858_v51 }
 0x125   : > { %652 = vst [vmem:[#allocation2] sm:$0xff] %v650_v56  ;;  %v651_v58 = vadd.f32 %v647_v57, %v287_v55 }
 0x127   : > { %653 = vst [vmem:[#allocation2 + $0x8] sm:$0xff] %v651_v58 }
 0x12c   : > { %v658_v59 = vld [vmem:[#allocation2] sm:$0xff] }
 0x12d   : > { %v667_v62 = vadd.f32 %v831_v60, %v658_v59 }
 0x12e   : > { %v659_v61 = vld [vmem:[#allocation2 + $0x8] sm:$0xff] }
 0x12f   : > { %v668_v63 = vadd.f32 %v831_v60, %v659_v61  ;;  %669 = vst [vmem:[%s1140_s3] sm:$0xff] %v667_v62 }
 0x131   : > { %670 = vst [vmem:[%s1140_s3 + $0x8] sm:$0xff] %v668_v63 }
 0x132 PF: > { %s13_s16 = sadd.s32 1, %s998_s16   ;;  %s1141_s12 = smov %s986_s13 }
 0x133   : > { %p10_p12 = scmp.ge.s32.totalorder %s13_s16, 4   ;;  %s1142_s13 = smov %s1056_s20 }
 0x134   : > { %s1143_s14 = smov %s994_s15  ;;  %s1144_s15 = smov %s1146_s17 }
 0x135   :  { %12 = sbr.rel (!%p10_p12) target bundleno = 3 (0x3), region = 104 }

</bundles_post_ra>
